<compile_context>
chip_gen: v7x
topology: tpu7x:2x2x1
jax: 0.10.0
libtpu: 0.0.40
codegen_flags: <defaults>
</compile_context>

<pallas_src>
import jax
import jax.numpy as jnp
from jax.experimental import pallas as pl
from jax.experimental.pallas import tpu as pltpu


# Architecture constants (from the PyTorch module).
HIDDEN_DIMS = (32, 128, 256, 512, 32)   # hidden widths of the 6-Linear stack
OUT_PER_BRANCH = 2                      # output_size = (2, 2)
NUM_LINEAR = 6
NUM_PRELU = 5


def _prelu(h, a):
    # PReLU, single shared slope (PyTorch default num_parameters=1).
    return jnp.where(h > 0, h, a * h)


def pnet_kernel(x_ref,
                w1f, w2, w3, w4, w5, w6f,     # bf16 weights
                b1f, b2, b3, b4, b5, b6f,     # f32 biases
                alpha_ref,                    # (2, NUM_PRELU) f32 in SMEM
                out_ref):                     # (bm, 4) f32
    x = x_ref[...]                            # (bm, D) bf16

    # ---- fused first layer (input shared by both branches) ---------------
    h1 = jnp.dot(x, w1f[...], preferred_element_type=jnp.float32) + b1f[...]
    hs = h1[:, :32]                           # snet half
    hv = h1[:, 32:]                           # vnet half

    mids = ((w2, b2), (w3, b3), (w4, b4), (w5, b5))

    def run_branch(h, br):                    # br 0 == snet, 1 == vnet
        h = _prelu(h, alpha_ref[br, 0]).astype(jnp.bfloat16)
        for li, (w, b) in enumerate(mids, start=1):
            h = jnp.dot(h, w[br], preferred_element_type=jnp.float32) + b[br]
            h = _prelu(h, alpha_ref[br, li]).astype(jnp.bfloat16)
            # Dropout (after layers 4 and 5) is identity in eval.
        return h                              # (bm, 32) bf16

    hs = run_branch(hs, 0)
    hv = run_branch(hv, 1)

    # ---- fused, column-permuted final layer -------------------------------
    # w6f is block-diagonal over branches with columns pre-permuted to
    # [s0, v0, s1, v1], so no slicing / concat epilogue is needed.
    h = jnp.concatenate([hs, hv], axis=1)     # (bm, 64) bf16
    out = jnp.dot(h, w6f[...], preferred_element_type=jnp.float32) + b6f[...]
    out_ref[...] = out.astype(out_ref.dtype)


def init_pnet_params(key, input_size):
    """Deterministic parameter init (PyTorch-Linear-like uniform bounds)."""
    dims = (input_size,) + HIDDEN_DIMS + (OUT_PER_BRANCH,)
    ws, bs = [], []
    for li in range(NUM_LINEAR):
        fan_in, fan_out = dims[li], dims[li + 1]
        bound = 1.0 / jnp.sqrt(jnp.float32(fan_in))
        key, kw, kb = jax.random.split(key, 3)
        # Stacked over the 2 branches (index 0 = snet, 1 = vnet).
        w = jax.random.uniform(kw, (2, fan_in, fan_out), jnp.float32,
                               -bound, bound)
        b = jax.random.uniform(kb, (2, 1, fan_out), jnp.float32,
                               -bound, bound)
        ws.append(w)
        bs.append(b)
    alphas = jnp.full((2, NUM_PRELU), 0.25, dtype=jnp.float32)  # PReLU default
    return ws, bs, alphas


def prepare_kernel_params(ws, bs, alphas):
    """Repack PyTorch-style per-branch params into the fused kernel layout."""
    bf16 = jnp.bfloat16

    # Fused L1: concat output columns of both branches -> (D, 64).
    w1f = jnp.concatenate([ws[0][0], ws[0][1]], axis=1).astype(bf16)
    b1f = jnp.concatenate([bs[0][0], bs[0][1]], axis=1)            # (1, 64) f32

    mids_w = tuple(ws[li].astype(bf16) for li in range(1, 5))      # (2, in, out)
    mids_b = tuple(bs[li] for li in range(1, 5))                   # (2, 1, out)

    # Fused, column-permuted final layer (block-diagonal over branches).
    w6, b6 = ws[5], bs[5]                                          # (2,32,2), (2,1,2)
    w6f = jnp.zeros((64, 4), jnp.float32)
    w6f = w6f.at[:32, 0].set(w6[0][:, 0])    # s[:, 0]
    w6f = w6f.at[32:, 1].set(w6[1][:, 0])    # v[:, 0]
    w6f = w6f.at[:32, 2].set(w6[0][:, 1])    # s[:, 1]
    w6f = w6f.at[32:, 3].set(w6[1][:, 1])    # v[:, 1]
    w6f = w6f.astype(bf16)
    b6f = jnp.stack([b6[0, 0, 0], b6[1, 0, 0],
                     b6[0, 0, 1], b6[1, 0, 1]])[None, :]           # (1, 4) f32

    return (w1f, *mids_w, w6f, b1f, *mids_b, b6f,
            alphas.astype(jnp.float32))


@jax.jit
def pnet_forward(x, params):
    (w1f, w2, w3, w4, w5, w6f,
     b1f, b2, b3, b4, b5, b6f, alphas) = params

    B, D = x.shape
    # Batch tile: big enough to fill the MXU, small enough that the f32
    # intermediates stay far inside the v7x scoped-VMEM budget.
    bm = 512 if B >= 512 else max(8, -(-B // 8) * 8)
    Bp = -(-B // bm) * bm

    xb = x.astype(jnp.bfloat16)
    if Bp != B:
        xb = jnp.pad(xb, ((0, Bp - B), (0, 0)))   # pad only when needed

    def fixed(shape):
        nd = len(shape)
        return pl.BlockSpec(shape, lambda i, _nd=nd: (0,) * _nd)

    in_specs = [
        pl.BlockSpec((bm, D), lambda i: (i, 0)),                 # x tile
        fixed(w1f.shape), fixed(w2.shape), fixed(w3.shape),
        fixed(w4.shape), fixed(w5.shape), fixed(w6f.shape),
        fixed(b1f.shape), fixed(b2.shape), fixed(b3.shape),
        fixed(b4.shape), fixed(b5.shape), fixed(b6f.shape),
        pl.BlockSpec(memory_space=pltpu.MemorySpace.SMEM),       # PReLU alphas
    ]

    out = pl.pallas_call(
        pnet_kernel,
        out_shape=jax.ShapeDtypeStruct((Bp, 4), jnp.float32),
        grid=(Bp // bm,),
        in_specs=in_specs,
        out_specs=pl.BlockSpec((bm, 4), lambda i: (i, 0)),
        compiler_params=pltpu.CompilerParams(
            dimension_semantics=("parallel",)),                  # megacore on v7x
    )(xb, w1f, w2, w3, w4, w5, w6f, b1f, b2, b3, b4, b5, b6f, alphas)
    return out[:B]


def pnet_reference(x, ws, bs, alphas):
    """Pure-JAX reference matching the PyTorch forward (eval mode), with the
    same bf16 weight/activation rounding the kernel uses."""
    outs = []
    for br in range(2):
        h = x.astype(jnp.bfloat16)
        for li in range(NUM_LINEAR):
            w = ws[li][br].astype(jnp.bfloat16)
            hf = jnp.dot(h, w, preferred_element_type=jnp.float32) + bs[li][br]
            if li < NUM_PRELU:
                a = alphas[br, li]
                hf = jnp.where(hf > 0, hf, a * hf)
                h = hf.astype(jnp.bfloat16)
            else:
                h = hf
        outs.append(h)
    s, v = outs
    return jnp.concatenate([s[:, 0:1], v[:, 0:1], s[:, 1:2], v[:, 1:2]],
                           axis=1)


if __name__ == "__main__":
    key = jax.random.PRNGKey(0)
    kx, kp = jax.random.split(key)

    batch = 2
    input_size = 16
    x = jax.random.normal(kx, (batch, input_size), dtype=jnp.float32)

    ws, bs, alphas = init_pnet_params(kp, input_size)
    params = prepare_kernel_params(ws, bs, alphas)

    out = pnet_forward(x, params)
    out = jax.block_until_ready(out)

    ref = pnet_reference(x, ws, bs, alphas)
    assert out.shape == (batch, 4), out.shape
    assert jnp.allclose(out, ref, atol=2e-3, rtol=2e-3), (out, ref)

    print("KERNEL_OK")
</pallas_src>

<mosaic_0001>
module attributes {stable_mosaic.version = 11 : i64} {
  func.func @pnet_kernel(%arg0: i32, %arg1: memref<8x16xbf16, #tpu.memory_space<vmem>>, %arg2: memref<16x64xbf16, #tpu.memory_space<vmem>>, %arg3: memref<2x32x128xbf16, #tpu.memory_space<vmem>>, %arg4: memref<2x128x256xbf16, #tpu.memory_space<vmem>>, %arg5: memref<2x256x512xbf16, #tpu.memory_space<vmem>>, %arg6: memref<2x512x32xbf16, #tpu.memory_space<vmem>>, %arg7: memref<64x4xbf16, #tpu.memory_space<vmem>>, %arg8: memref<1x64xf32, #tpu.memory_space<vmem>>, %arg9: memref<2x1x128xf32, #tpu.memory_space<vmem>>, %arg10: memref<2x1x256xf32, #tpu.memory_space<vmem>>, %arg11: memref<2x1x512xf32, #tpu.memory_space<vmem>>, %arg12: memref<2x1x32xf32, #tpu.memory_space<vmem>>, %arg13: memref<1x4xf32, #tpu.memory_space<vmem>>, %arg14: memref<2x5xf32, #tpu.memory_space<smem>>, %arg15: memref<8x4xf32, #tpu.memory_space<vmem>>) attributes {dimension_semantics = [#tpu.dimension_semantics<parallel>], iteration_bounds = array<i64: 1>, scalar_prefetch = 0 : i64, scratch_operands = 0 : i64, tpu.core_type = #tpu.core_type<tc>, window_params = [{transform_indices = @transform_0, window_bounds = array<i64: 8, 16>}, {pipeline_mode = #tpu.pipeline_mode<synchronous>, transform_indices = @transform_1, window_bounds = array<i64: 16, 64>}, {pipeline_mode = #tpu.pipeline_mode<synchronous>, transform_indices = @transform_2, window_bounds = array<i64: 2, 32, 128>}, {pipeline_mode = #tpu.pipeline_mode<synchronous>, transform_indices = @transform_3, window_bounds = array<i64: 2, 128, 256>}, {pipeline_mode = #tpu.pipeline_mode<synchronous>, transform_indices = @transform_4, window_bounds = array<i64: 2, 256, 512>}, {pipeline_mode = #tpu.pipeline_mode<synchronous>, transform_indices = @transform_5, window_bounds = array<i64: 2, 512, 32>}, {pipeline_mode = #tpu.pipeline_mode<synchronous>, transform_indices = @transform_6, window_bounds = array<i64: 64, 4>}, {pipeline_mode = #tpu.pipeline_mode<synchronous>, transform_indices = @transform_7, window_bounds = array<i64: 1, 64>}, {pipeline_mode = #tpu.pipeline_mode<synchronous>, transform_indices = @transform_8, window_bounds = array<i64: 2, 1, 128>}, {pipeline_mode = #tpu.pipeline_mode<synchronous>, transform_indices = @transform_9, window_bounds = array<i64: 2, 1, 256>}, {pipeline_mode = #tpu.pipeline_mode<synchronous>, transform_indices = @transform_10, window_bounds = array<i64: 2, 1, 512>}, {pipeline_mode = #tpu.pipeline_mode<synchronous>, transform_indices = @transform_11, window_bounds = array<i64: 2, 1, 32>}, {pipeline_mode = #tpu.pipeline_mode<synchronous>, transform_indices = @transform_12, window_bounds = array<i64: 1, 4>}, {transform_indices = @transform_13, window_bounds = array<i64: 2, 5>}, {transform_indices = @transform_14, window_bounds = array<i64: 8, 4>}]} {
    %c0 = arith.constant 0 : index
    %c0_0 = arith.constant 0 : index
    %0 = vector.load %arg1[%c0, %c0_0] : memref<8x16xbf16, #tpu.memory_space<vmem>>, vector<8x16xbf16>
    %c0_1 = arith.constant 0 : index
    %c0_2 = arith.constant 0 : index
    %1 = vector.load %arg2[%c0_1, %c0_2] : memref<16x64xbf16, #tpu.memory_space<vmem>>, vector<16x64xbf16>
    %cst = arith.constant dense<0.000000e+00> : vector<8x64xf32>
    %2 = tpu.matmul %0, %1, %cst {dimension_numbers = #tpu.dot_dimension_numbers<[1], [0], [0], [1], [0, 0, 1, 1], [], []>} : vector<8x16xbf16>, vector<16x64xbf16>, vector<8x64xf32> -> vector<8x64xf32>
    %c0_3 = arith.constant 0 : index
    %c0_4 = arith.constant 0 : index
    %3 = vector.load %arg8[%c0_3, %c0_4] : memref<1x64xf32, #tpu.memory_space<vmem>>, vector<1x64xf32>
    %4 = vector.broadcast %3 : vector<1x64xf32> to vector<8x64xf32>
    %5 = arith.addf %2, %4 : vector<8x64xf32>
    %6 = vector.extract_strided_slice %5 {offsets = [0, 0], sizes = [8, 32], strides = [1, 1]} : vector<8x64xf32> to vector<8x32xf32>
    %7 = vector.extract_strided_slice %5 {offsets = [0, 32], sizes = [8, 32], strides = [1, 1]} : vector<8x64xf32> to vector<8x32xf32>
    %c0_5 = arith.constant 0 : index
    %c0_6 = arith.constant 0 : index
    %8 = memref.load %arg14[%c0_5, %c0_6] : memref<2x5xf32, #tpu.memory_space<smem>>
    %cst_7 = arith.constant 0.000000e+00 : f32
    %9 = vector.broadcast %cst_7 : f32 to vector<8x32xf32>
    %10 = arith.cmpf ogt, %6, %9 : vector<8x32xf32>
    %11 = vector.broadcast %8 : f32 to vector<8x32xf32>
    %12 = arith.mulf %11, %6 : vector<8x32xf32>
    %13 = arith.select %10, %6, %12 : vector<8x32xi1>, vector<8x32xf32>
    %14 = arith.truncf %13 : vector<8x32xf32> to vector<8x32xbf16>
    %c0_8 = arith.constant 0 : index
    %c0_9 = arith.constant 0 : index
    %c0_10 = arith.constant 0 : index
    %15 = vector.load %arg3[%c0_8, %c0_9, %c0_10] : memref<2x32x128xbf16, #tpu.memory_space<vmem>>, vector<1x32x128xbf16>
    %16 = vector.shape_cast %15 : vector<1x32x128xbf16> to vector<32x128xbf16>
    %cst_11 = arith.constant dense<0.000000e+00> : vector<8x128xf32>
    %17 = tpu.matmul %14, %16, %cst_11 {dimension_numbers = #tpu.dot_dimension_numbers<[1], [0], [0], [1], [0, 0, 1, 1], [], []>} : vector<8x32xbf16>, vector<32x128xbf16>, vector<8x128xf32> -> vector<8x128xf32>
    %c0_12 = arith.constant 0 : index
    %c0_13 = arith.constant 0 : index
    %c0_14 = arith.constant 0 : index
    %18 = vector.load %arg9[%c0_12, %c0_13, %c0_14] : memref<2x1x128xf32, #tpu.memory_space<vmem>>, vector<1x1x128xf32>
    %19 = vector.shape_cast %18 : vector<1x1x128xf32> to vector<1x128xf32>
    %20 = vector.broadcast %19 : vector<1x128xf32> to vector<8x128xf32>
    %21 = arith.addf %17, %20 : vector<8x128xf32>
    %c0_15 = arith.constant 0 : index
    %c1 = arith.constant 1 : index
    %22 = memref.load %arg14[%c0_15, %c1] : memref<2x5xf32, #tpu.memory_space<smem>>
    %cst_16 = arith.constant 0.000000e+00 : f32
    %23 = vector.broadcast %cst_16 : f32 to vector<8x128xf32>
    %24 = arith.cmpf ogt, %21, %23 : vector<8x128xf32>
    %25 = vector.broadcast %22 : f32 to vector<8x128xf32>
    %26 = arith.mulf %25, %21 : vector<8x128xf32>
    %27 = arith.select %24, %21, %26 : vector<8x128xi1>, vector<8x128xf32>
    %28 = arith.truncf %27 : vector<8x128xf32> to vector<8x128xbf16>
    %c0_17 = arith.constant 0 : index
    %c0_18 = arith.constant 0 : index
    %c0_19 = arith.constant 0 : index
    %29 = vector.load %arg4[%c0_17, %c0_18, %c0_19] : memref<2x128x256xbf16, #tpu.memory_space<vmem>>, vector<1x128x256xbf16>
    %30 = vector.shape_cast %29 : vector<1x128x256xbf16> to vector<128x256xbf16>
    %cst_20 = arith.constant dense<0.000000e+00> : vector<8x256xf32>
    %31 = tpu.matmul %28, %30, %cst_20 {dimension_numbers = #tpu.dot_dimension_numbers<[1], [0], [0], [1], [0, 0, 1, 1], [], []>} : vector<8x128xbf16>, vector<128x256xbf16>, vector<8x256xf32> -> vector<8x256xf32>
    %c0_21 = arith.constant 0 : index
    %c0_22 = arith.constant 0 : index
    %c0_23 = arith.constant 0 : index
    %32 = vector.load %arg10[%c0_21, %c0_22, %c0_23] : memref<2x1x256xf32, #tpu.memory_space<vmem>>, vector<1x1x256xf32>
    %33 = vector.shape_cast %32 : vector<1x1x256xf32> to vector<1x256xf32>
    %34 = vector.broadcast %33 : vector<1x256xf32> to vector<8x256xf32>
    %35 = arith.addf %31, %34 : vector<8x256xf32>
    %c0_24 = arith.constant 0 : index
    %c2 = arith.constant 2 : index
    %36 = memref.load %arg14[%c0_24, %c2] : memref<2x5xf32, #tpu.memory_space<smem>>
    %cst_25 = arith.constant 0.000000e+00 : f32
    %37 = vector.broadcast %cst_25 : f32 to vector<8x256xf32>
    %38 = arith.cmpf ogt, %35, %37 : vector<8x256xf32>
    %39 = vector.broadcast %36 : f32 to vector<8x256xf32>
    %40 = arith.mulf %39, %35 : vector<8x256xf32>
    %41 = arith.select %38, %35, %40 : vector<8x256xi1>, vector<8x256xf32>
    %42 = arith.truncf %41 : vector<8x256xf32> to vector<8x256xbf16>
    %c0_26 = arith.constant 0 : index
    %c0_27 = arith.constant 0 : index
    %c0_28 = arith.constant 0 : index
    %43 = vector.load %arg5[%c0_26, %c0_27, %c0_28] : memref<2x256x512xbf16, #tpu.memory_space<vmem>>, vector<1x256x512xbf16>
    %44 = vector.shape_cast %43 : vector<1x256x512xbf16> to vector<256x512xbf16>
    %cst_29 = arith.constant dense<0.000000e+00> : vector<8x512xf32>
    %45 = tpu.matmul %42, %44, %cst_29 {dimension_numbers = #tpu.dot_dimension_numbers<[1], [0], [0], [1], [0, 0, 1, 1], [], []>} : vector<8x256xbf16>, vector<256x512xbf16>, vector<8x512xf32> -> vector<8x512xf32>
    %c0_30 = arith.constant 0 : index
    %c0_31 = arith.constant 0 : index
    %c0_32 = arith.constant 0 : index
    %46 = vector.load %arg11[%c0_30, %c0_31, %c0_32] : memref<2x1x512xf32, #tpu.memory_space<vmem>>, vector<1x1x512xf32>
    %47 = vector.shape_cast %46 : vector<1x1x512xf32> to vector<1x512xf32>
    %48 = vector.broadcast %47 : vector<1x512xf32> to vector<8x512xf32>
    %49 = arith.addf %45, %48 : vector<8x512xf32>
    %c0_33 = arith.constant 0 : index
    %c3 = arith.constant 3 : index
    %50 = memref.load %arg14[%c0_33, %c3] : memref<2x5xf32, #tpu.memory_space<smem>>
    %cst_34 = arith.constant 0.000000e+00 : f32
    %51 = vector.broadcast %cst_34 : f32 to vector<8x512xf32>
    %52 = arith.cmpf ogt, %49, %51 : vector<8x512xf32>
    %53 = vector.broadcast %50 : f32 to vector<8x512xf32>
    %54 = arith.mulf %53, %49 : vector<8x512xf32>
    %55 = arith.select %52, %49, %54 : vector<8x512xi1>, vector<8x512xf32>
    %56 = arith.truncf %55 : vector<8x512xf32> to vector<8x512xbf16>
    %c0_35 = arith.constant 0 : index
    %c0_36 = arith.constant 0 : index
    %c0_37 = arith.constant 0 : index
    %57 = vector.load %arg6[%c0_35, %c0_36, %c0_37] : memref<2x512x32xbf16, #tpu.memory_space<vmem>>, vector<1x512x32xbf16>
    %58 = vector.shape_cast %57 : vector<1x512x32xbf16> to vector<512x32xbf16>
    %cst_38 = arith.constant dense<0.000000e+00> : vector<8x32xf32>
    %59 = tpu.matmul %56, %58, %cst_38 {dimension_numbers = #tpu.dot_dimension_numbers<[1], [0], [0], [1], [0, 0, 1, 1], [], []>} : vector<8x512xbf16>, vector<512x32xbf16>, vector<8x32xf32> -> vector<8x32xf32>
    %c0_39 = arith.constant 0 : index
    %c0_40 = arith.constant 0 : index
    %c0_41 = arith.constant 0 : index
    %60 = vector.load %arg12[%c0_39, %c0_40, %c0_41] : memref<2x1x32xf32, #tpu.memory_space<vmem>>, vector<1x1x32xf32>
    %61 = vector.shape_cast %60 : vector<1x1x32xf32> to vector<1x32xf32>
    %62 = vector.broadcast %61 : vector<1x32xf32> to vector<8x32xf32>
    %63 = arith.addf %59, %62 : vector<8x32xf32>
    %c0_42 = arith.constant 0 : index
    %c4 = arith.constant 4 : index
    %64 = memref.load %arg14[%c0_42, %c4] : memref<2x5xf32, #tpu.memory_space<smem>>
    %cst_43 = arith.constant 0.000000e+00 : f32
    %65 = vector.broadcast %cst_43 : f32 to vector<8x32xf32>
    %66 = arith.cmpf ogt, %63, %65 : vector<8x32xf32>
    %67 = vector.broadcast %64 : f32 to vector<8x32xf32>
    %68 = arith.mulf %67, %63 : vector<8x32xf32>
    %69 = arith.select %66, %63, %68 : vector<8x32xi1>, vector<8x32xf32>
    %70 = arith.truncf %69 : vector<8x32xf32> to vector<8x32xbf16>
    %c1_44 = arith.constant 1 : index
    %c0_45 = arith.constant 0 : index
    %71 = memref.load %arg14[%c1_44, %c0_45] : memref<2x5xf32, #tpu.memory_space<smem>>
    %cst_46 = arith.constant 0.000000e+00 : f32
    %72 = vector.broadcast %cst_46 : f32 to vector<8x32xf32>
    %73 = arith.cmpf ogt, %7, %72 : vector<8x32xf32>
    %74 = vector.broadcast %71 : f32 to vector<8x32xf32>
    %75 = arith.mulf %74, %7 : vector<8x32xf32>
    %76 = arith.select %73, %7, %75 : vector<8x32xi1>, vector<8x32xf32>
    %77 = arith.truncf %76 : vector<8x32xf32> to vector<8x32xbf16>
    %c1_47 = arith.constant 1 : index
    %c0_48 = arith.constant 0 : index
    %c0_49 = arith.constant 0 : index
    %78 = vector.load %arg3[%c1_47, %c0_48, %c0_49] : memref<2x32x128xbf16, #tpu.memory_space<vmem>>, vector<1x32x128xbf16>
    %79 = vector.shape_cast %78 : vector<1x32x128xbf16> to vector<32x128xbf16>
    %cst_50 = arith.constant dense<0.000000e+00> : vector<8x128xf32>
    %80 = tpu.matmul %77, %79, %cst_50 {dimension_numbers = #tpu.dot_dimension_numbers<[1], [0], [0], [1], [0, 0, 1, 1], [], []>} : vector<8x32xbf16>, vector<32x128xbf16>, vector<8x128xf32> -> vector<8x128xf32>
    %c1_51 = arith.constant 1 : index
    %c0_52 = arith.constant 0 : index
    %c0_53 = arith.constant 0 : index
    %81 = vector.load %arg9[%c1_51, %c0_52, %c0_53] : memref<2x1x128xf32, #tpu.memory_space<vmem>>, vector<1x1x128xf32>
    %82 = vector.shape_cast %81 : vector<1x1x128xf32> to vector<1x128xf32>
    %83 = vector.broadcast %82 : vector<1x128xf32> to vector<8x128xf32>
    %84 = arith.addf %80, %83 : vector<8x128xf32>
    %c1_54 = arith.constant 1 : index
    %c1_55 = arith.constant 1 : index
    %85 = memref.load %arg14[%c1_54, %c1_55] : memref<2x5xf32, #tpu.memory_space<smem>>
    %cst_56 = arith.constant 0.000000e+00 : f32
    %86 = vector.broadcast %cst_56 : f32 to vector<8x128xf32>
    %87 = arith.cmpf ogt, %84, %86 : vector<8x128xf32>
    %88 = vector.broadcast %85 : f32 to vector<8x128xf32>
    %89 = arith.mulf %88, %84 : vector<8x128xf32>
    %90 = arith.select %87, %84, %89 : vector<8x128xi1>, vector<8x128xf32>
    %91 = arith.truncf %90 : vector<8x128xf32> to vector<8x128xbf16>
    %c1_57 = arith.constant 1 : index
    %c0_58 = arith.constant 0 : index
    %c0_59 = arith.constant 0 : index
    %92 = vector.load %arg4[%c1_57, %c0_58, %c0_59] : memref<2x128x256xbf16, #tpu.memory_space<vmem>>, vector<1x128x256xbf16>
    %93 = vector.shape_cast %92 : vector<1x128x256xbf16> to vector<128x256xbf16>
    %cst_60 = arith.constant dense<0.000000e+00> : vector<8x256xf32>
    %94 = tpu.matmul %91, %93, %cst_60 {dimension_numbers = #tpu.dot_dimension_numbers<[1], [0], [0], [1], [0, 0, 1, 1], [], []>} : vector<8x128xbf16>, vector<128x256xbf16>, vector<8x256xf32> -> vector<8x256xf32>
    %c1_61 = arith.constant 1 : index
    %c0_62 = arith.constant 0 : index
    %c0_63 = arith.constant 0 : index
    %95 = vector.load %arg10[%c1_61, %c0_62, %c0_63] : memref<2x1x256xf32, #tpu.memory_space<vmem>>, vector<1x1x256xf32>
    %96 = vector.shape_cast %95 : vector<1x1x256xf32> to vector<1x256xf32>
    %97 = vector.broadcast %96 : vector<1x256xf32> to vector<8x256xf32>
    %98 = arith.addf %94, %97 : vector<8x256xf32>
    %c1_64 = arith.constant 1 : index
    %c2_65 = arith.constant 2 : index
    %99 = memref.load %arg14[%c1_64, %c2_65] : memref<2x5xf32, #tpu.memory_space<smem>>
    %cst_66 = arith.constant 0.000000e+00 : f32
    %100 = vector.broadcast %cst_66 : f32 to vector<8x256xf32>
    %101 = arith.cmpf ogt, %98, %100 : vector<8x256xf32>
    %102 = vector.broadcast %99 : f32 to vector<8x256xf32>
    %103 = arith.mulf %102, %98 : vector<8x256xf32>
    %104 = arith.select %101, %98, %103 : vector<8x256xi1>, vector<8x256xf32>
    %105 = arith.truncf %104 : vector<8x256xf32> to vector<8x256xbf16>
    %c1_67 = arith.constant 1 : index
    %c0_68 = arith.constant 0 : index
    %c0_69 = arith.constant 0 : index
    %106 = vector.load %arg5[%c1_67, %c0_68, %c0_69] : memref<2x256x512xbf16, #tpu.memory_space<vmem>>, vector<1x256x512xbf16>
    %107 = vector.shape_cast %106 : vector<1x256x512xbf16> to vector<256x512xbf16>
    %cst_70 = arith.constant dense<0.000000e+00> : vector<8x512xf32>
    %108 = tpu.matmul %105, %107, %cst_70 {dimension_numbers = #tpu.dot_dimension_numbers<[1], [0], [0], [1], [0, 0, 1, 1], [], []>} : vector<8x256xbf16>, vector<256x512xbf16>, vector<8x512xf32> -> vector<8x512xf32>
    %c1_71 = arith.constant 1 : index
    %c0_72 = arith.constant 0 : index
    %c0_73 = arith.constant 0 : index
    %109 = vector.load %arg11[%c1_71, %c0_72, %c0_73] : memref<2x1x512xf32, #tpu.memory_space<vmem>>, vector<1x1x512xf32>
    %110 = vector.shape_cast %109 : vector<1x1x512xf32> to vector<1x512xf32>
    %111 = vector.broadcast %110 : vector<1x512xf32> to vector<8x512xf32>
    %112 = arith.addf %108, %111 : vector<8x512xf32>
    %c1_74 = arith.constant 1 : index
    %c3_75 = arith.constant 3 : index
    %113 = memref.load %arg14[%c1_74, %c3_75] : memref<2x5xf32, #tpu.memory_space<smem>>
    %cst_76 = arith.constant 0.000000e+00 : f32
    %114 = vector.broadcast %cst_76 : f32 to vector<8x512xf32>
    %115 = arith.cmpf ogt, %112, %114 : vector<8x512xf32>
    %116 = vector.broadcast %113 : f32 to vector<8x512xf32>
    %117 = arith.mulf %116, %112 : vector<8x512xf32>
    %118 = arith.select %115, %112, %117 : vector<8x512xi1>, vector<8x512xf32>
    %119 = arith.truncf %118 : vector<8x512xf32> to vector<8x512xbf16>
    %c1_77 = arith.constant 1 : index
    %c0_78 = arith.constant 0 : index
    %c0_79 = arith.constant 0 : index
    %120 = vector.load %arg6[%c1_77, %c0_78, %c0_79] : memref<2x512x32xbf16, #tpu.memory_space<vmem>>, vector<1x512x32xbf16>
    %121 = vector.shape_cast %120 : vector<1x512x32xbf16> to vector<512x32xbf16>
    %cst_80 = arith.constant dense<0.000000e+00> : vector<8x32xf32>
    %122 = tpu.matmul %119, %121, %cst_80 {dimension_numbers = #tpu.dot_dimension_numbers<[1], [0], [0], [1], [0, 0, 1, 1], [], []>} : vector<8x512xbf16>, vector<512x32xbf16>, vector<8x32xf32> -> vector<8x32xf32>
    %c1_81 = arith.constant 1 : index
    %c0_82 = arith.constant 0 : index
    %c0_83 = arith.constant 0 : index
    %123 = vector.load %arg12[%c1_81, %c0_82, %c0_83] : memref<2x1x32xf32, #tpu.memory_space<vmem>>, vector<1x1x32xf32>
    %124 = vector.shape_cast %123 : vector<1x1x32xf32> to vector<1x32xf32>
    %125 = vector.broadcast %124 : vector<1x32xf32> to vector<8x32xf32>
    %126 = arith.addf %122, %125 : vector<8x32xf32>
    %c1_84 = arith.constant 1 : index
    %c4_85 = arith.constant 4 : index
    %127 = memref.load %arg14[%c1_84, %c4_85] : memref<2x5xf32, #tpu.memory_space<smem>>
    %cst_86 = arith.constant 0.000000e+00 : f32
    %128 = vector.broadcast %cst_86 : f32 to vector<8x32xf32>
    %129 = arith.cmpf ogt, %126, %128 : vector<8x32xf32>
    %130 = vector.broadcast %127 : f32 to vector<8x32xf32>
    %131 = arith.mulf %130, %126 : vector<8x32xf32>
    %132 = arith.select %129, %126, %131 : vector<8x32xi1>, vector<8x32xf32>
    %133 = arith.truncf %132 : vector<8x32xf32> to vector<8x32xbf16>
    %134 = tpu.concatenate %70, %133 in 1 : vector<8x32xbf16>, vector<8x32xbf16> -> vector<8x64xbf16>
    %c0_87 = arith.constant 0 : index
    %c0_88 = arith.constant 0 : index
    %135 = vector.load %arg7[%c0_87, %c0_88] : memref<64x4xbf16, #tpu.memory_space<vmem>>, vector<64x4xbf16>
    %cst_89 = arith.constant dense<0.000000e+00> : vector<8x4xf32>
    %136 = tpu.matmul %134, %135, %cst_89 {dimension_numbers = #tpu.dot_dimension_numbers<[1], [0], [0], [1], [0, 0, 1, 1], [], []>} : vector<8x64xbf16>, vector<64x4xbf16>, vector<8x4xf32> -> vector<8x4xf32>
    %c0_90 = arith.constant 0 : index
    %c0_91 = arith.constant 0 : index
    %137 = vector.load %arg13[%c0_90, %c0_91] : memref<1x4xf32, #tpu.memory_space<vmem>>, vector<1x4xf32>
    %138 = vector.broadcast %137 : vector<1x4xf32> to vector<8x4xf32>
    %139 = arith.addf %136, %138 : vector<8x4xf32>
    %c0_92 = arith.constant 0 : index
    %c0_93 = arith.constant 0 : index
    %140 = vector.load %arg15[%c0_92, %c0_93] : memref<8x4xf32, #tpu.memory_space<vmem>>, vector<8x4xf32>
    tpu.vector_store %arg15[%c0_92, %c0_93], %139 {strides = array<i32>} : memref<8x4xf32, #tpu.memory_space<vmem>>, vector<8x4xf32>,
    return
  }
  func.func @transform_0(%arg0: i32) -> (i32, i32) {
    %c0_i32 = arith.constant 0 : i32
    %c0_i32_0 = arith.constant 0 : i32
    return %arg0, %c0_i32 : i32, i32
  }
  func.func @transform_1(%arg0: i32) -> (i32, i32) {
    %c0_i32 = arith.constant 0 : i32
    %c0_i32_0 = arith.constant 0 : i32
    %c0_i32_1 = arith.constant 0 : i32
    return %c0_i32, %c0_i32_0 : i32, i32
  }
  func.func @transform_2(%arg0: i32) -> (i32, i32, i32) {
    %c0_i32 = arith.constant 0 : i32
    %c0_i32_0 = arith.constant 0 : i32
    %c0_i32_1 = arith.constant 0 : i32
    %c0_i32_2 = arith.constant 0 : i32
    return %c0_i32, %c0_i32_0, %c0_i32_1 : i32, i32, i32
  }
  func.func @transform_3(%arg0: i32) -> (i32, i32, i32) {
    %c0_i32 = arith.constant 0 : i32
    %c0_i32_0 = arith.constant 0 : i32
    %c0_i32_1 = arith.constant 0 : i32
    %c0_i32_2 = arith.constant 0 : i32
    return %c0_i32, %c0_i32_0, %c0_i32_1 : i32, i32, i32
  }
  func.func @transform_4(%arg0: i32) -> (i32, i32, i32) {
    %c0_i32 = arith.constant 0 : i32
    %c0_i32_0 = arith.constant 0 : i32
    %c0_i32_1 = arith.constant 0 : i32
    %c0_i32_2 = arith.constant 0 : i32
    return %c0_i32, %c0_i32_0, %c0_i32_1 : i32, i32, i32
  }
  func.func @transform_5(%arg0: i32) -> (i32, i32, i32) {
    %c0_i32 = arith.constant 0 : i32
    %c0_i32_0 = arith.constant 0 : i32
    %c0_i32_1 = arith.constant 0 : i32
    %c0_i32_2 = arith.constant 0 : i32
    return %c0_i32, %c0_i32_0, %c0_i32_1 : i32, i32, i32
  }
  func.func @transform_6(%arg0: i32) -> (i32, i32) {
    %c0_i32 = arith.constant 0 : i32
    %c0_i32_0 = arith.constant 0 : i32
    %c0_i32_1 = arith.constant 0 : i32
    return %c0_i32, %c0_i32_0 : i32, i32
  }
  func.func @transform_7(%arg0: i32) -> (i32, i32) {
    %c0_i32 = arith.constant 0 : i32
    %c0_i32_0 = arith.constant 0 : i32
    %c0_i32_1 = arith.constant 0 : i32
    return %c0_i32, %c0_i32_0 : i32, i32
  }
  func.func @transform_8(%arg0: i32) -> (i32, i32, i32) {
    %c0_i32 = arith.constant 0 : i32
    %c0_i32_0 = arith.constant 0 : i32
    %c0_i32_1 = arith.constant 0 : i32
    %c0_i32_2 = arith.constant 0 : i32
    return %c0_i32, %c0_i32_0, %c0_i32_1 : i32, i32, i32
  }
  func.func @transform_9(%arg0: i32) -> (i32, i32, i32) {
    %c0_i32 = arith.constant 0 : i32
    %c0_i32_0 = arith.constant 0 : i32
    %c0_i32_1 = arith.constant 0 : i32
    %c0_i32_2 = arith.constant 0 : i32
    return %c0_i32, %c0_i32_0, %c0_i32_1 : i32, i32, i32
  }
  func.func @transform_10(%arg0: i32) -> (i32, i32, i32) {
    %c0_i32 = arith.constant 0 : i32
    %c0_i32_0 = arith.constant 0 : i32
    %c0_i32_1 = arith.constant 0 : i32
    %c0_i32_2 = arith.constant 0 : i32
    return %c0_i32, %c0_i32_0, %c0_i32_1 : i32, i32, i32
  }
  func.func @transform_11(%arg0: i32) -> (i32, i32, i32) {
    %c0_i32 = arith.constant 0 : i32
    %c0_i32_0 = arith.constant 0 : i32
    %c0_i32_1 = arith.constant 0 : i32
    %c0_i32_2 = arith.constant 0 : i32
    return %c0_i32, %c0_i32_0, %c0_i32_1 : i32, i32, i32
  }
  func.func @transform_12(%arg0: i32) -> (i32, i32) {
    %c0_i32 = arith.constant 0 : i32
    %c0_i32_0 = arith.constant 0 : i32
    %c0_i32_1 = arith.constant 0 : i32
    return %c0_i32, %c0_i32_0 : i32, i32
  }
  func.func @transform_13(%arg0: i32) -> (i32, i32) {
    %c0_i32 = arith.constant 0 : i32
    %c0_i32_0 = arith.constant 0 : i32
    %c0_i32_1 = arith.constant 0 : i32
    return %c0_i32, %c0_i32_0 : i32, i32
  }
  func.func @transform_14(%arg0: i32) -> (i32, i32) {
    %c0_i32 = arith.constant 0 : i32
    %c0_i32_0 = arith.constant 0 : i32
    return %arg0, %c0_i32 : i32, i32
  }
}

</mosaic_0001>

<bundles_post_ra>
// kernel: pnet_forward.1
= control target key start
LH: loop header
LB: loop body
LE: loop exit
PB: predicated region body
PF: predicated region fallthrough
CT: control target
= control target key end

     0   :  { %19 = vsyncpa [#allocation3], 0  ;;  %s3764_s0 = inlined_call_operand.vmem [shape: bf16[8,16], index: 0, kind: input, shape index: {}]   ;;  %s3765_s1 = inlined_call_operand.vmem [shape: bf16[16,64], index: 1, kind: input, shape index: {}]   ;;  %s3766_s2 = inlined_call_operand.vmem [shape: bf16[2,32,128], index: 2, kind: input, shape index: {}]   ;;  %s3767_s3 = inlined_call_operand.vmem [shape: bf16[2,128,256], index: 3, kind: input, shape index: {}]   ;;  %s3768_s4 = inlined_call_operand.hbm [shape: bf16[2,256,512], index: 4, kind: input, shape index: {}]   ;;  %s3769_s5 = inlined_call_operand.vmem [shape: bf16[2,512,32], index: 5, kind: input, shape index: {}]   ;;  %s3770_s6 = inlined_call_operand.vmem [shape: bf16[64,4], index: 6, kind: input, shape index: {}]   ;;  %s3771_s7 = inlined_call_operand.vmem [shape: f32[1,64], index: 7, kind: input, shape index: {}]   ;;  %s3772_s8 = inlined_call_operand.vmem [shape: f32[2,1,128], index: 8, kind: input, shape index: {}]   ;;  %s3773_s9 = inlined_call_operand.vmem [shape: f32[2,1,256], index: 9, kind: input, shape index: {}]   ;;  %s3774_s10 = inlined_call_operand.vmem [shape: f32[2,1,512], index: 10, kind: input, shape index: {}]   ;;  %s3775_s11 = inlined_call_operand.vmem [shape: f32[2,1,32], index: 11, kind: input, shape index: {}]   ;;  %s3776_s12 = inlined_call_operand.vmem [shape: f32[1,4], index: 12, kind: input, shape index: {}]   ;;  %s3777_s13 = inlined_call_operand.vmem [shape: f32[2,5], index: 13, kind: input, shape index: {}]   ;;  %s3778_s14 = inlined_call_operand.vmem [shape: f32[8,4], index: 14, kind: output, shape index: {}]  }
   0x1   :  { %20 = vsyncpa [#allocation4], 0  ;;  %s3261_s29 = smov [#allocation2]   ;;  %s63_s17 = sshll.u32 %s3777_s13, 4  ;;  %s64_s17 = int_to_ptr.vmem [resolvable:$true] %s63_s17 }
   0x2   :  { %s34_s30 = sshll.u32 %s3261_s29, 4  ;;  %s3223_s20 = scalar_lea.hbm %s3768_s4, 16384  ;;  %s35_s30 = int_to_ptr.vmem [resolvable:$true] %s34_s30 }
   0x3   :  { %p3224_p0 = scmp.ne.s32.totalorder %s3768_s4, %s3223_s20  ;;  %p3227_p1 = scmp.lt.u32.totalorder %s3223_s20, %s3768_s4 }
   0x5   :  { %p3229_p2 = pnand %p3227_p1, %p3224_p0 }
   0x7   :  { %3232 = shalt.err (!%p3229_p2)
}
   0x8   :  { %s3233_s25 = scalar_lea.vmem %s35_s30, 16384  ;;  %p3238_p4 = scmp.lt.s32.totalorder %s35_s30, %s35_s30 }
   0x9   :  { %p3234_p3 = scmp.ne.s32.totalorder %s35_s30, %s3233_s25  ;;  %p3239_p5 = scmp.lt.s32.totalorder %s3233_s25, %s3233_s25 }
   0xb   :  { %p3240_p6 = por %p3239_p5, %p3238_p4 }
   0xd   :  { %p3241_p7 = pnand %p3240_p6, %p3234_p3 }
   0xf   :  { %3244 = shalt.err (!%p3241_p7)
}
  0x10   :  { %s3262_s13 = smov 256   ;;  %s3263_s26 = smov 16  }
  0x11   :  { %40 = dma.hbm_to_vmem [thread:$0]  %s3768_s4, 16384, %s35_s30, [#allocation3], %s3262_s13, %s3262_s13, %s3263_s26  }
  0x12   :  { %s3245_s29 = scalar_lea.vmem %s64_s17, 32  ;;  %p3250_p9 = scmp.lt.s32.totalorder %s64_s17, %s64_s17 }
  0x13   :  { %p3246_p8 = scmp.ne.s32.totalorder %s64_s17, %s3245_s29  ;;  %p3251_p10 = scmp.lt.s32.totalorder %s3245_s29, %s3245_s29 }
  0x15   :  { %p3252_p11 = por %p3251_p10, %p3250_p9 }
  0x17   :  { %p3253_p12 = pnand %p3252_p11, %p3246_p8 }
  0x19   :  { %3256 = shalt.err (!%p3253_p12)
}
  0x1a   :  { %s3264_s15 = smov [#allocation5]  }
  0x1b   :  { %66 = dma.vmem_to_smem %s64_s17, 32, %s3264_s15, [#allocation4]  }
  0x1c   :  { %3257 = dma.done.wait [#allocation3], 16384  }
  0x1d   :  { %3258 = vsyncadd [#allocation3], 4294950912 }
  0x1e   :  { %3259 = dma.done.wait [#allocation4], 32  }
  0x1f   :  { %3260 = vsyncadd [#allocation4], 4294967264 }
  0x20   :  { %73 = sfence }
  0x21   :  { %v2910_v0 = vld [vmem:[%s3765_s1] sm:$0xff]   ;;  %v3265_v1 = vmov 0.0   ;;  %vm91_vm0 = vcmask 130048   ;;  %vm3266_vm1 = vmmov 0   ;;  %v2912_v4 = vld [vmem:[%s3766_s2 + $0x8] sm:$0xff]   ;;  %s135_s20 = sld [smem:[#allocation5]] }
  0x22   :  { %2867 = vmatprep.subr.bf16.mxu0 %v3265_v1  ;;  %v75_v2 = vld [vmem:[%s3764_s0] sm:$0xf]  ;;  %2873 = vmatprep.subr.bf16.mxu1 %v3265_v1  ;;  %s2550_s21 = sld [smem:[#allocation5 + $0x80]]  ;;  %v2915_v6 = vld [vmem:[%s3767_s3 + $0x4] ss:$8 sps:$4 sm:$0xff]   ;;  %vm164_vm3 = vcmask 261120  }
  0x23   :  { %2868 = vmatpush3.bf16.msra.mxu0 %v2910_v0  ;;  %2869 = vmatprep.mubr.msk.bf16.mxu0 %vm3266_vm1, %v3265_v1  ;;  %v2911_v3 = vld [vmem:[%s3766_s2] sm:$0xff]   ;;  %v2918_v7 = vld [vmem:[%s3767_s3 + $0x14] ss:$8 sps:$4 sm:$0xff]   ;;  %v2916_v8 = vld [vmem:[%s3767_s3 + $0x10] ss:$8 sps:$4 sm:$0xff]   ;;  %v3268_v35 = vmov 0  }
  0x24   :  { %2877 = vmatprep.mubr.msk.bf16.mxu1 %vm3266_vm1, %v3265_v1  ;;  %2874 = vmatpush3.bf16.msra.mxu1 %v2911_v3  ;;  %v2913_v5 = vld [vmem:[%s3767_s3] ss:$8 sps:$4 sm:$0xff]   ;;  %v2921_v10 = vld [vmem:[%s3767_s3 + $0x24] ss:$8 sps:$4 sm:$0xff]   ;;  %v2924_v18 = vld [vmem:[%s3767_s3 + $0x34] ss:$8 sps:$4 sm:$0xff]  }
  0x25   :  { %2875 = vmatprep.subr.bf16.mxu1 %v3265_v1  ;;  %322 = vmatprep.subr.bf16.mxu0 %v2915_v6  ;;  %v2426_v9 = vld [vmem:[%s3771_s7] ss:$0 sm:$0xff]  ;;  %v2922_v24 = vld [vmem:[%s3767_s3 + $0x30] ss:$8 sps:$4 sm:$0xff]   ;;  %v2927_v27 = vld [vmem:[%s3767_s3 + $0x44] ss:$8 sps:$4 sm:$0xff]  }
  0x26   :  { %2870 = vmatmul.mubr.msk.bf16.vlgmr.msra.gmra.mrb[0].mxu0 %vm91_vm0, %v75_v2  ;;  %v2919_v16 = vld [vmem:[%s3767_s3 + $0x20] ss:$8 sps:$4 sm:$0xff]   ;;  %v2930_v29 = vld [vmem:[%s3767_s3 + $0x54] ss:$8 sps:$4 sm:$0xff]   ;;  %v2928_v30 = vld [vmem:[%s3767_s3 + $0x50] ss:$8 sps:$4 sm:$0xff]  }
  0x27   :  { %323 = vmatpush1.bf16.msra.mxu0 %v2913_v5  ;;  %v137_v12 = vstv %s135_s20  ;;  %v2925_v28 = vld [vmem:[%s3767_s3 + $0x40] ss:$8 sps:$4 sm:$0xff]   ;;  %v2933_v31 = vld [vmem:[%s3767_s3 + $0x64] ss:$8 sps:$4 sm:$0xff]   ;;  %v2936_v33 = vld [vmem:[%s3767_s3 + $0x74] ss:$8 sps:$4 sm:$0xff]   ;;  %354 = vmatprep.mubr.bf16.mxu0 %v3268_v35 }
  0x28   :  { %2876 = vmatpush3.bf16.msra.mxu1 %v2912_v4  ;;  %324 = vmatprep.subr.bf16.mxu0 %v2918_v7  ;;  %v1229_v13 = vstv %s2550_s21  ;;  %s3267_s21 = smov 96   ;;  %v2931_v32 = vld [vmem:[%s3767_s3 + $0x60] ss:$8 sps:$4 sm:$0xff]   ;;  %v2934_v34 = vld [vmem:[%s3767_s3 + $0x70] ss:$8 sps:$4 sm:$0xff]   ;;  %s2433_s1 = sld [smem:[#allocation5 + $0x1]] }
  0x29   :  { %v2937_v36 = vld [vmem:[#allocation2] ss:$16 sps:$4 sm:$0xff]   ;;  %v2939_v37 = vld [vmem:[#allocation2 + $0x4] ss:$16 sps:$4 sm:$0xff]   ;;  %v2942_v38 = vld [vmem:[#allocation2 + $0xc] ss:$16 sps:$4 sm:$0xff]  }
  0x2a   :  { %v2945_v39 = vld [vmem:[#allocation2 + $0x24] ss:$16 sps:$4 sm:$0xff]   ;;  %779 = vmatprep.subr.bf16.mxu1 %v2939_v37  ;;  %v2943_v40 = vld [vmem:[#allocation2 + $0x20] ss:$16 sps:$4 sm:$0xff]   ;;  %v3012_v37 = vld [vmem:[#allocation2 + $0x188] ss:$16 sps:$4 sm:$0xff]  }
  0x2b   :  { %325 = vmatpush1.bf16.msra.mxu0 %v2916_v8  ;;  %v2951_v41 = vld [vmem:[#allocation2 + $0x44] ss:$16 sps:$4 sm:$0xff]   ;;  %v2949_v42 = vld [vmem:[#allocation2 + $0x40] ss:$16 sps:$4 sm:$0xff]   ;;  %s2450_s22 = sld [smem:[#allocation5 + $0x2]]  ;;  %s2660_s30 = sld [smem:[#allocation5 + $0x83]] }
  0x2c   :  { %326 = vmatprep.subr.bf16.mxu0 %v2921_v10  ;;  %v2957_v43 = vld [vmem:[#allocation2 + $0x64] ss:$16 sps:$4 sm:$0xff]   ;;  %v2955_v44 = vld [vmem:[#allocation2 + $0x60] ss:$16 sps:$4 sm:$0xff]   ;;  %s2594_s24 = sld [smem:[#allocation5 + $0x82]] }
  0x2d   :  { %v2963_v45 = vld [vmem:[#allocation2 + $0x84] ss:$16 sps:$4 sm:$0xff]   ;;  %v2961_v46 = vld [vmem:[#allocation2 + $0x80] ss:$16 sps:$4 sm:$0xff]  }
  0x2e   :  { %v2969_v47 = vld [vmem:[#allocation2 + $0xa4] ss:$16 sps:$4 sm:$0xff]   ;;  %v2967_v48 = vld [vmem:[#allocation2 + $0xa0] ss:$16 sps:$4 sm:$0xff]   ;;  %v210_v4 = vstv %s2433_s1 }
  0x2f   :  { %327 = vmatpush1.bf16.msra.mxu0 %v2919_v16  ;;  %v2975_v49 = vld [vmem:[#allocation2 + $0xc4] ss:$16 sps:$4 sm:$0xff]   ;;  %v2973_v50 = vld [vmem:[#allocation2 + $0xc0] ss:$16 sps:$4 sm:$0xff]   ;;  %v2952_v16 = vld [vmem:[#allocation2 + $0x48] ss:$16 sps:$4 sm:$0xff]  }
  0x30   :  { %328 = vmatprep.subr.bf16.mxu0 %v2924_v18  ;;  %v2981_v51 = vld [vmem:[#allocation2 + $0xe4] ss:$16 sps:$4 sm:$0xff]   ;;  %v2979_v52 = vld [vmem:[#allocation2 + $0xe0] ss:$16 sps:$4 sm:$0xff]   ;;  %v2958_v18 = vld [vmem:[#allocation2 + $0x68] ss:$16 sps:$4 sm:$0xff]  }
  0x31   :  { %v2987_v53 = vld [vmem:[#allocation2 + $0x104] ss:$16 sps:$4 sm:$0xff]   ;;  %v2985_v54 = vld [vmem:[#allocation2 + $0x100] ss:$16 sps:$4 sm:$0xff]  }
  0x32   :  { %v2993_v55 = vld [vmem:[#allocation2 + $0x124] ss:$16 sps:$4 sm:$0xff]   ;;  %v2991_v56 = vld [vmem:[#allocation2 + $0x120] ss:$16 sps:$4 sm:$0xff]  }
  0x33   :  { %329 = vmatpush1.bf16.msra.mxu0 %v2922_v24  ;;  %v2999_v57 = vld [vmem:[#allocation2 + $0x144] ss:$16 sps:$4 sm:$0xff]   ;;  %v2997_v58 = vld [vmem:[#allocation2 + $0x140] ss:$16 sps:$4 sm:$0xff]   ;;  %v2976_v24 = vld [vmem:[#allocation2 + $0xc8] ss:$16 sps:$4 sm:$0xff]  }
  0x34   :  { %330 = vmatprep.subr.bf16.mxu0 %v2927_v27  ;;  %v3005_v59 = vld [vmem:[#allocation2 + $0x164] ss:$16 sps:$4 sm:$0xff]   ;;  %v3003_v60 = vld [vmem:[#allocation2 + $0x160] ss:$16 sps:$4 sm:$0xff]   ;;  %v2990_v27 = vld [vmem:[#allocation2 + $0x10c] ss:$16 sps:$4 sm:$0xff]  }
  0x35   :  { %v3011_v61 = vld [vmem:[#allocation2 + $0x184] ss:$16 sps:$4 sm:$0xff]   ;;  %v3009_v62 = vld [vmem:[#allocation2 + $0x180] ss:$16 sps:$4 sm:$0xff]  }
  0x36   :  { %v3017_v63 = vld [vmem:[#allocation2 + $0x1a4] ss:$16 sps:$4 sm:$0xff]   ;;  %v3015_v0 = vld [vmem:[#allocation2 + $0x1a0] ss:$16 sps:$4 sm:$0xff]  }
  0x37   :  { %331 = vmatpush1.bf16.msra.mxu0 %v2925_v28  ;;  %v2429_v2 = vld [vmem:[%s3772_s8] ss:$0 sm:$0xff]  ;;  %v2988_v28 = vld [vmem:[#allocation2 + $0x108] ss:$16 sps:$4 sm:$0xff]  }
  0x38   :  { %332 = vmatprep.subr.bf16.mxu0 %v2930_v29  ;;  %v2996_v29 = vld [vmem:[#allocation2 + $0x12c] ss:$16 sps:$4 sm:$0xff]  }
  0x3b   :  { %333 = vmatpush1.bf16.msra.mxu0 %v2928_v30  ;;  %v2994_v30 = vld [vmem:[#allocation2 + $0x128] ss:$16 sps:$4 sm:$0xff]  }
  0x3c   :  { %334 = vmatprep.subr.bf16.mxu0 %v2933_v31  ;;  %v3002_v31 = vld [vmem:[#allocation2 + $0x14c] ss:$16 sps:$4 sm:$0xff]  }
  0x3f   :  { %335 = vmatpush1.bf16.msra.mxu0 %v2931_v32  ;;  %v3000_v32 = vld [vmem:[#allocation2 + $0x148] ss:$16 sps:$4 sm:$0xff]  }
  0x40   :  { %336 = vmatprep.subr.bf16.mxu0 %v2936_v33  ;;  %v3008_v33 = vld [vmem:[#allocation2 + $0x16c] ss:$16 sps:$4 sm:$0xff]  }
  0x43   :  { %337 = vmatpush1.bf16.msra.mxu0 %v2934_v34  ;;  %v3006_v34 = vld [vmem:[#allocation2 + $0x168] ss:$16 sps:$4 sm:$0xff]  }
  0x44   :  { %820 = vmatprep.subr.bf16.mxu0 %v2942_v38  ;;  %v3020_v38 = vld [vmem:[#allocation2 + $0x1ac] ss:$16 sps:$4 sm:$0xff]  }
  0xf9   :  { %v129_v11 = vpop.f32.mrb[0].mxu0 }
  0xfa   :  { %v130_v14 = vadd.f32 %v2426_v9, %v129_v11  ;;  %v2871_v15 = vpop.f32.mrb[1].mxu0  ;;  %v2940_v11 = vld [vmem:[#allocation2 + $0x8] ss:$16 sps:$4 sm:$0xff]  }
  0xfb   :  { %v132_v17 = vpop.f32.mrb[2].mxu0  ;;  %v2954_v15 = vld [vmem:[#allocation2 + $0x4c] ss:$16 sps:$4 sm:$0xff]  }
  0xfc   :  { %v2872_v19 = vpop.f32.mrb[3].mxu0  ;;  %vm136_vm2 = vcmp.gt.f32.partialorder %v130_v14, 0.0  ;;  %v138_v20 = vmul.f32 %v137_v12, %v130_v14  ;;  %v1230_v21 = vmul.f32 %v1229_v13, %v130_v14  ;;  %v2948_v13 = vld [vmem:[#allocation2 + $0x2c] ss:$16 sps:$4 sm:$0xff]  }
  0xfd   :  { %v2960_v17 = vld [vmem:[#allocation2 + $0x6c] ss:$16 sps:$4 sm:$0xff]  }
  0xfe   :  { %v1231_v22 = vsel %vm136_vm2, %v130_v14, %v1230_v21  ;;  %v139_v23 = vsel %vm136_vm2, %v130_v14, %v138_v20  ;;  %v2946_v14 = vld [vmem:[#allocation2 + $0x28] ss:$16 sps:$4 sm:$0xff]   ;;  %v2966_v19 = vld [vmem:[#allocation2 + $0x8c] ss:$16 sps:$4 sm:$0xff]  }
  0xff   :  { %v1232_v25 = vpack.c.bf16 %v1231_v22, %v1231_v22  ;;  %v140_v26 = vpack.c.bf16 %v139_v23, %v139_v23  ;;  %v2964_v20 = vld [vmem:[#allocation2 + $0x88] ss:$16 sps:$4 sm:$0xff]   ;;  %v2972_v21 = vld [vmem:[#allocation2 + $0xac] ss:$16 sps:$4 sm:$0xff]  }
 0x100   :  { %v2970_v22 = vld [vmem:[#allocation2 + $0xa8] ss:$16 sps:$4 sm:$0xff]   ;;  %v2978_v23 = vld [vmem:[#allocation2 + $0xcc] ss:$16 sps:$4 sm:$0xff]  }
 0x101   :  { %1247 = vrot.lane.b32.xlu0 %v1232_v25, %s3267_s21  ;;  %2878 = vmatmul.mubr.msk.bf16.vlgmr.msra.gmra.mrb[0].mxu1 %vm164_vm3, %v140_v26  ;;  %v2984_v25 = vld [vmem:[#allocation2 + $0xec] ss:$16 sps:$4 sm:$0xff]   ;;  %v2982_v26 = vld [vmem:[#allocation2 + $0xe8] ss:$16 sps:$4 sm:$0xff]   ;;  %s2759_s21 = sld [smem:[#allocation5 + $0x84]] }
 0x102   :  { %780 = vmatpush1.bf16.msra.mxu1 %v2937_v36  ;;  %v3014_v36 = vld [vmem:[#allocation2 + $0x18c] ss:$16 sps:$4 sm:$0xff]  }
 0x103   :  { %781 = vmatprep.subr.bf16.mxu1 %v2945_v39  ;;  %v3018_v39 = vld [vmem:[#allocation2 + $0x1a8] ss:$16 sps:$4 sm:$0xff]  }
 0x106   :  { %782 = vmatpush1.bf16.msra.mxu1 %v2943_v40  ;;  %v3023_v40 = vld [vmem:[#allocation2 + $0x1c4] ss:$16 sps:$4 sm:$0xff]  }
 0x107   :  { %783 = vmatprep.subr.bf16.mxu1 %v2951_v41  ;;  %v3026_v41 = vld [vmem:[#allocation2 + $0x1cc] ss:$16 sps:$4 sm:$0xff]  }
 0x10a   :  { %784 = vmatpush1.bf16.msra.mxu1 %v2949_v42  ;;  %v3021_v42 = vld [vmem:[#allocation2 + $0x1c0] ss:$16 sps:$4 sm:$0xff]  }
 0x10b   :  { %785 = vmatprep.subr.bf16.mxu1 %v2957_v43  ;;  %v3024_v43 = vld [vmem:[#allocation2 + $0x1c8] ss:$16 sps:$4 sm:$0xff]  }
 0x10e   :  { %786 = vmatpush1.bf16.msra.mxu1 %v2955_v44  ;;  %v3029_v44 = vld [vmem:[#allocation2 + $0x1e4] ss:$16 sps:$4 sm:$0xff]  }
 0x10f   :  { %787 = vmatprep.subr.bf16.mxu1 %v2963_v45  ;;  %v3032_v45 = vld [vmem:[#allocation2 + $0x1ec] ss:$16 sps:$4 sm:$0xff]  }
 0x112   :  { %788 = vmatpush1.bf16.msra.mxu1 %v2961_v46  ;;  %v3027_v46 = vld [vmem:[#allocation2 + $0x1e0] ss:$16 sps:$4 sm:$0xff]  }
 0x113   :  { %789 = vmatprep.subr.bf16.mxu1 %v2969_v47  ;;  %v3030_v47 = vld [vmem:[#allocation2 + $0x1e8] ss:$16 sps:$4 sm:$0xff]  }
 0x116   :  { %790 = vmatpush1.bf16.msra.mxu1 %v2967_v48  ;;  %v3033_v48 = vld [vmem:[%s3769_s5 + $0x40] sm:$0xff]  }
 0x117   :  { %791 = vmatprep.subr.bf16.mxu1 %v2975_v49  ;;  %v3035_v49 = vld [vmem:[%s3769_s5 + $0xc0] sm:$0xff]  }
 0x11a   :  { %792 = vmatpush1.bf16.msra.mxu1 %v2973_v50  ;;  %v232_v50 = vlaneseq }
 0x11b   :  { %793 = vmatprep.subr.bf16.mxu1 %v2981_v51 }
 0x11c   :  { %v3441_v51 = vshrl.u32 %v232_v50, 7 }
 0x11e   :  { %794 = vmatpush1.bf16.msra.mxu1 %v2979_v52  ;;  %v3444_v52 = vsub.s32 0, %v3441_v51 }
 0x11f   :  { %795 = vmatprep.subr.bf16.mxu1 %v2987_v53  ;;  %v230_v53 = vld [vmem:[%s3773_s9] sm:$0x3] }
 0x122   :  { %796 = vmatpush1.bf16.msra.mxu1 %v2985_v54  ;;  %v3450_v54 = vsub.s32 1, %v3441_v51 }
 0x123   :  { %797 = vmatprep.subr.bf16.mxu1 %v2993_v55  ;;  %v235_v55 = vrot.slane %v230_v53, %v3444_v52 }
 0x126   :  { %798 = vmatpush1.bf16.msra.mxu1 %v2991_v56  ;;  %v239_v56 = vrot.slane %v230_v53, %v3450_v54 }
 0x127   :  { %799 = vmatprep.subr.bf16.mxu1 %v2999_v57 }
 0x12a   :  { %800 = vmatpush1.bf16.msra.mxu1 %v2997_v58  ;;  %v366_v58 = vstv %s2450_s22  ;;  %s2515_s22 = sld [smem:[#allocation5 + $0x3]] }
 0x12b   :  { %801 = vmatprep.subr.bf16.mxu1 %v3005_v59 }
 0x12e   :  { %802 = vmatpush1.bf16.msra.mxu1 %v3003_v60 }
 0x12f   :  { %803 = vmatprep.subr.bf16.mxu1 %v3011_v61 }
 0x132   :  { %804 = vmatpush1.bf16.msra.mxu1 %v3009_v62 }
 0x133   :  { %805 = vmatprep.subr.bf16.mxu1 %v3017_v63 }
 0x136   :  { %806 = vmatpush1.bf16.msra.mxu1 %v3015_v0 }
 0x137   :  { %807 = vmatprep.subr.bf16.mxu1 %v3023_v40  ;;  %v453_v40 = vsub.s32 3, %v3441_v51 }
 0x13a   :  { %808 = vmatpush1.bf16.msra.mxu1 %v3021_v42 }
 0x13b   :  { %809 = vmatprep.subr.bf16.mxu1 %v3029_v44 }
 0x13e   :  { %810 = vmatpush1.bf16.msra.mxu1 %v3027_v46  ;;  %v866_v46 = vstv %s2515_s22 }
 0x13f   :  { %2771 = vmatprep.subr.bf16.mxu1 %v3033_v48 }
 0x1d4   :  { %v202_v3 = vpop.f32.mrb[0].mxu1 }
 0x1d5   :  { %v203_v5 = vadd.f32 %v2429_v2, %v202_v3  ;;  %v2879_v6 = vpop.f32.mrb[1].mxu1 }
 0x1d6   :  { %v205_v7 = vpop.f32.mrb[2].mxu1  ;;  %v3034_v6 = vld [vmem:[%s3769_s5] sm:$0xff]  }
 0x1d7   :  { %vm209_vm4 = vcmp.gt.f32.partialorder %v203_v5, 0.0  ;;  %v211_v8 = vmul.f32 %v210_v4, %v203_v5  ;;  %v2880_v9 = vpop.f32.mrb[3].mxu1  ;;  %v3036_v7 = vld [vmem:[%s3769_s5 + $0x80] sm:$0xff]  }
 0x1d8   :  { %v3037_v9 = vld [vmem:[%s3769_s5 + $0x48] sm:$0xff]  }
 0x1d9   :  { %v212_v10 = vsel %vm209_vm4, %v203_v5, %v211_v8 }
 0x1da   :  { %v213_v12 = vpack.c.bf16 %v212_v10, %v212_v10  ;;  %v3039_v10 = vld [vmem:[%s3769_s5 + $0xc8] sm:$0xff]  }
 0x1dc   :  { %355 = vmatmul.mubr.bf16.vlgmr.msra.gmra.mrb[4].mxu0 %v213_v12  ;;  %v3040_v12 = vld [vmem:[%s3769_s5 + $0x88] sm:$0xff]  }
 0x1dd   :  { %821 = vmatpush1.bf16.msra.mxu0 %v2940_v11  ;;  %v3038_v11 = vld [vmem:[%s3769_s5 + $0x8] sm:$0xff]  }
 0x1de   :  { %822 = vmatprep.subr.bf16.mxu0 %v2948_v13  ;;  %v3041_v13 = vld [vmem:[%s3769_s5 + $0x50] sm:$0xff]  }
 0x1e1   :  { %823 = vmatpush1.bf16.msra.mxu0 %v2946_v14  ;;  %v3043_v14 = vld [vmem:[%s3769_s5 + $0xd0] sm:$0xff]  }
 0x1e2   :  { %824 = vmatprep.subr.bf16.mxu0 %v2954_v15  ;;  %v3042_v15 = vld [vmem:[%s3769_s5 + $0x10] sm:$0xff]  }
 0x1e5   :  { %825 = vmatpush1.bf16.msra.mxu0 %v2952_v16  ;;  %v3044_v16 = vld [vmem:[%s3769_s5 + $0x90] sm:$0xff]  }
 0x1e6   :  { %826 = vmatprep.subr.bf16.mxu0 %v2960_v17  ;;  %v3045_v17 = vld [vmem:[%s3769_s5 + $0x58] sm:$0xff]  }
 0x1e9   :  { %827 = vmatpush1.bf16.msra.mxu0 %v2958_v18  ;;  %v3047_v18 = vld [vmem:[%s3769_s5 + $0xd8] sm:$0xff]  }
 0x1ea   :  { %828 = vmatprep.subr.bf16.mxu0 %v2966_v19  ;;  %v3046_v19 = vld [vmem:[%s3769_s5 + $0x18] sm:$0xff]  }
 0x1ed   :  { %829 = vmatpush1.bf16.msra.mxu0 %v2964_v20  ;;  %v3048_v20 = vld [vmem:[%s3769_s5 + $0x98] sm:$0xff]  }
 0x1ee   :  { %830 = vmatprep.subr.bf16.mxu0 %v2972_v21  ;;  %v3049_v21 = vld [vmem:[%s3769_s5 + $0x60] sm:$0xff]  }
 0x1f1   :  { %831 = vmatpush1.bf16.msra.mxu0 %v2970_v22  ;;  %v3051_v22 = vld [vmem:[%s3769_s5 + $0xe0] sm:$0xff]  }
 0x1f2   :  { %832 = vmatprep.subr.bf16.mxu0 %v2978_v23  ;;  %v3050_v23 = vld [vmem:[%s3769_s5 + $0x20] sm:$0xff]  }
 0x1f5   :  { %833 = vmatpush1.bf16.msra.mxu0 %v2976_v24  ;;  %v3052_v24 = vld [vmem:[%s3769_s5 + $0xa0] sm:$0xff]  }
 0x1f6   :  { %834 = vmatprep.subr.bf16.mxu0 %v2984_v25  ;;  %v3053_v25 = vld [vmem:[%s3769_s5 + $0x68] sm:$0xff]  }
 0x1f9   :  { %835 = vmatpush1.bf16.msra.mxu0 %v2982_v26  ;;  %v3055_v26 = vld [vmem:[%s3769_s5 + $0xe8] sm:$0xff]  }
 0x1fa   :  { %836 = vmatprep.subr.bf16.mxu0 %v2990_v27  ;;  %v3054_v27 = vld [vmem:[%s3769_s5 + $0x28] sm:$0xff]  }
 0x1fd   :  { %837 = vmatpush1.bf16.msra.mxu0 %v2988_v28  ;;  %v3056_v28 = vld [vmem:[%s3769_s5 + $0xa8] sm:$0xff]  }
 0x1fe   :  { %838 = vmatprep.subr.bf16.mxu0 %v2996_v29  ;;  %v3057_v29 = vld [vmem:[%s3769_s5 + $0x70] sm:$0xff]  }
 0x201   :  { %839 = vmatpush1.bf16.msra.mxu0 %v2994_v30  ;;  %v3059_v30 = vld [vmem:[%s3769_s5 + $0xf0] sm:$0xff]  }
 0x202   :  { %840 = vmatprep.subr.bf16.mxu0 %v3002_v31  ;;  %v3058_v31 = vld [vmem:[%s3769_s5 + $0x30] sm:$0xff]  }
 0x205   :  { %841 = vmatpush1.bf16.msra.mxu0 %v3000_v32  ;;  %v3060_v32 = vld [vmem:[%s3769_s5 + $0xb0] sm:$0xff]  }
 0x206   :  { %842 = vmatprep.subr.bf16.mxu0 %v3008_v33  ;;  %v3061_v33 = vld [vmem:[%s3769_s5 + $0x78] sm:$0xff]  }
 0x209   :  { %843 = vmatpush1.bf16.msra.mxu0 %v3006_v34  ;;  %v3063_v34 = vld [vmem:[%s3769_s5 + $0xf8] sm:$0xff]  }
 0x20a   :  { %844 = vmatprep.subr.bf16.mxu0 %v3014_v36  ;;  %v3062_v36 = vld [vmem:[%s3769_s5 + $0x38] sm:$0xff]  }
 0x20d   :  { %845 = vmatpush1.bf16.msra.mxu0 %v3012_v37  ;;  %v3064_v37 = vld [vmem:[%s3769_s5 + $0xb8] sm:$0xff]  }
 0x20e   :  { %846 = vmatprep.subr.bf16.mxu0 %v3020_v38  ;;  %v449_v38 = vsub.s32 2, %v3441_v51 }
 0x211   :  { %847 = vmatpush1.bf16.msra.mxu0 %v3018_v39  ;;  %v437_v39 = vld [vmem:[%s3774_s10] sm:$0xf] }
 0x212   :  { %848 = vmatprep.subr.bf16.mxu0 %v3026_v41  ;;  %v442_v41 = vrot.slane %v437_v39, %v3444_v52  ;;  %v450_v42 = vrot.slane %v437_v39, %v449_v38  ;;  %v454_v44 = vrot.slane %v437_v39, %v453_v40 }
 0x215   :  { %849 = vmatpush1.bf16.msra.mxu0 %v3024_v43  ;;  %v446_v43 = vrot.slane %v437_v39, %v3450_v54  ;;  %v3117_v39 = vld [vmem:[#allocation2 + $0x284] ss:$16 sps:$4 sm:$0xff]  }
 0x216   :  { %850 = vmatprep.subr.bf16.mxu0 %v3032_v45 }
 0x219   :  { %851 = vmatpush1.bf16.msra.mxu0 %v3030_v47 }
 0x21a   :  { %2793 = vmatprep.subr.bf16.mxu0 %v3035_v49 }
 0x2af   :  { %v356_v57 = vpop.f32.mrb[4].mxu0 }
 0x2b0   :  { %v357_v59 = vadd.f32 %v356_v57, %v235_v55  ;;  %v358_v60 = vpop.f32.mrb[5].mxu0 }
 0x2b1   :  { %v359_v61 = vadd.f32 %v358_v60, %v239_v56  ;;  %v360_v62 = vpop.f32.mrb[6].mxu0 }
 0x2b2   :  { %vm364_vm5 = vcmp.gt.f32.partialorder %v357_v59, 0.0  ;;  %v367_v63 = vmul.f32 %v366_v58, %v357_v59  ;;  %v361_v0 = vpop.f32.mrb[7].mxu0 }
 0x2b3   :  { %vm365_vm6 = vcmp.gt.f32.partialorder %v359_v61, 0.0  ;;  %v368_v2 = vmul.f32 %v366_v58, %v359_v61 }
 0x2b4   :  { %v369_v3 = vsel %vm364_vm5, %v357_v59, %v367_v63  ;;  %vm2375_vm5 = vcmask 523264  }
 0x2b5   :  { %v370_v4 = vsel %vm365_vm6, %v359_v61, %v368_v2  ;;  %v371_v8 = vpack.c.bf16 %v369_v3, %v369_v3  ;;  %vm2418_vm6 = vcmask 31744  }
 0x2b6   :  { %v372_v5 = vpack.c.bf16 %v370_v4, %v370_v4 }
 0x2b8   :  { %811 = vmatprep.mubr.bf16.mxu1 %v372_v5  ;;  %852 = vmatprep.mubr.bf16.mxu0 %v372_v5 }
 0x2b9   :  { %812 = vmatmul.mubr.bf16.vlgmr.msra.gmra.mrb[4].mxu1 %v371_v8  ;;  %853 = vmatmul.mubr.bf16.vlgmr.msra.gmra.mrb[8].mxu0 %v371_v8  ;;  %v3065_v8 = vld [vmem:[%s3766_s2 + $0x10] sm:$0xff]  }
 0x2ba   :  { %2772 = vmatpush3.bf16.msra.mxu1 %v3034_v6  ;;  %2794 = vmatpush3.bf16.msra.mxu0 %v3036_v7 }
 0x2bb   :  { %2773 = vmatprep.subr.bf16.mxu1 %v3037_v9  ;;  %2795 = vmatprep.subr.bf16.mxu0 %v3039_v10 }
 0x2be   :  { %2774 = vmatpush3.bf16.msra.mxu1 %v3038_v11  ;;  %2796 = vmatpush3.bf16.msra.mxu0 %v3040_v12  ;;  %v3066_v11 = vld [vmem:[%s3766_s2 + $0x18] sm:$0xff]   ;;  %v3069_v12 = vld [vmem:[%s3767_s3 + $0x84] ss:$8 sps:$4 sm:$0xff]  }
 0x2bf   :  { %2775 = vmatprep.subr.bf16.mxu1 %v3041_v13  ;;  %2797 = vmatprep.subr.bf16.mxu0 %v3043_v14  ;;  %v3067_v13 = vld [vmem:[%s3767_s3 + $0x80] ss:$8 sps:$4 sm:$0xff]   ;;  %v3072_v14 = vld [vmem:[%s3767_s3 + $0x94] ss:$8 sps:$4 sm:$0xff]  }
 0x2c2   :  { %2776 = vmatpush3.bf16.msra.mxu1 %v3042_v15  ;;  %2798 = vmatpush3.bf16.msra.mxu0 %v3044_v16  ;;  %v1248_v15 = vpop.permute.xlu0 %1247  ;;  %v3070_v16 = vld [vmem:[%s3767_s3 + $0x90] ss:$8 sps:$4 sm:$0xff]  }
 0x2c3   :  { %2777 = vmatprep.subr.bf16.mxu1 %v3045_v17  ;;  %2799 = vmatprep.subr.bf16.mxu0 %v3047_v18  ;;  %v3075_v17 = vld [vmem:[%s3767_s3 + $0xa4] ss:$8 sps:$4 sm:$0xff]   ;;  %v3073_v18 = vld [vmem:[%s3767_s3 + $0xa0] ss:$8 sps:$4 sm:$0xff]  }
 0x2c6   :  { %2778 = vmatpush3.bf16.msra.mxu1 %v3046_v19  ;;  %2800 = vmatpush3.bf16.msra.mxu0 %v3048_v20  ;;  %v3078_v19 = vld [vmem:[%s3767_s3 + $0xb4] ss:$8 sps:$4 sm:$0xff]   ;;  %v3081_v20 = vld [vmem:[%s3767_s3 + $0xc4] ss:$8 sps:$4 sm:$0xff]  }
 0x2c7   :  { %2779 = vmatprep.subr.bf16.mxu1 %v3049_v21  ;;  %2801 = vmatprep.subr.bf16.mxu0 %v3051_v22  ;;  %v3079_v21 = vld [vmem:[%s3767_s3 + $0xc0] ss:$8 sps:$4 sm:$0xff]   ;;  %v3084_v22 = vld [vmem:[%s3767_s3 + $0xd4] ss:$8 sps:$4 sm:$0xff]  }
 0x2ca   :  { %2780 = vmatpush3.bf16.msra.mxu1 %v3050_v23  ;;  %2802 = vmatpush3.bf16.msra.mxu0 %v3052_v24  ;;  %v3082_v23 = vld [vmem:[%s3767_s3 + $0xd0] ss:$8 sps:$4 sm:$0xff]   ;;  %v3087_v24 = vld [vmem:[%s3767_s3 + $0xe4] ss:$8 sps:$4 sm:$0xff]  }
 0x2cb   :  { %2781 = vmatprep.subr.bf16.mxu1 %v3053_v25  ;;  %2803 = vmatprep.subr.bf16.mxu0 %v3055_v26  ;;  %v3085_v25 = vld [vmem:[%s3767_s3 + $0xe0] ss:$8 sps:$4 sm:$0xff]   ;;  %v3090_v26 = vld [vmem:[%s3767_s3 + $0xf4] ss:$8 sps:$4 sm:$0xff]  }
 0x2ce   :  { %2782 = vmatpush3.bf16.msra.mxu1 %v3054_v27  ;;  %2804 = vmatpush3.bf16.msra.mxu0 %v3056_v28  ;;  %v3088_v27 = vld [vmem:[%s3767_s3 + $0xf0] ss:$8 sps:$4 sm:$0xff]  }
 0x2cf   :  { %2783 = vmatprep.subr.bf16.mxu1 %v3057_v29  ;;  %2805 = vmatprep.subr.bf16.mxu0 %v3059_v30  ;;  %v3091_v28 = vld [vmem:[#allocation2 + $0x200] ss:$16 sps:$4 sm:$0xff]   ;;  %v3093_v29 = vld [vmem:[#allocation2 + $0x204] ss:$16 sps:$4 sm:$0xff]   ;;  %v3096_v30 = vld [vmem:[#allocation2 + $0x20c] ss:$16 sps:$4 sm:$0xff]  }
 0x2d2   :  { %2784 = vmatpush3.bf16.msra.mxu1 %v3058_v31  ;;  %2806 = vmatpush3.bf16.msra.mxu0 %v3060_v32  ;;  %v3099_v31 = vld [vmem:[#allocation2 + $0x224] ss:$16 sps:$4 sm:$0xff]   ;;  %v3097_v32 = vld [vmem:[#allocation2 + $0x220] ss:$16 sps:$4 sm:$0xff]  }
 0x2d3   :  { %2785 = vmatprep.subr.bf16.mxu1 %v3061_v33  ;;  %2807 = vmatprep.subr.bf16.mxu0 %v3063_v34  ;;  %v3105_v33 = vld [vmem:[#allocation2 + $0x244] ss:$16 sps:$4 sm:$0xff]   ;;  %v3103_v34 = vld [vmem:[#allocation2 + $0x240] ss:$16 sps:$4 sm:$0xff]  }
 0x2d6   :  { %2786 = vmatpush3.bf16.msra.mxu1 %v3062_v36  ;;  %2808 = vmatpush3.bf16.msra.mxu0 %v3064_v37  ;;  %v3111_v36 = vld [vmem:[#allocation2 + $0x264] ss:$16 sps:$4 sm:$0xff]   ;;  %v3109_v37 = vld [vmem:[#allocation2 + $0x260] ss:$16 sps:$4 sm:$0xff]  }
 0x2d7   :  { %2881 = vmatprep.subr.bf16.mxu1 %v3265_v1  ;;  %1879 = vmatprep.subr.bf16.mxu0 %v3093_v29  ;;  %v3120_v29 = vld [vmem:[#allocation2 + $0x28c] ss:$16 sps:$4 sm:$0xff]  }
 0x38c   :  { %v813_v45 = vpop.f32.mrb[4].mxu1  ;;  %v854_v47 = vpop.f32.mrb[8].mxu0 }
 0x38d   :  { %v814_v48 = vadd.f32 %v813_v45, %v442_v41  ;;  %v855_v49 = vadd.f32 %v854_v47, %v450_v42  ;;  %v815_v50 = vpop.f32.mrb[5].mxu1  ;;  %v856_v53 = vpop.f32.mrb[9].mxu0  ;;  %v3115_v41 = vld [vmem:[#allocation2 + $0x280] ss:$16 sps:$4 sm:$0xff]   ;;  %v3123_v42 = vld [vmem:[#allocation2 + $0x2a4] ss:$16 sps:$4 sm:$0xff]  }
 0x38e   :  { %v816_v55 = vadd.f32 %v815_v50, %v446_v43  ;;  %v857_v56 = vadd.f32 %v856_v53, %v454_v44  ;;  %v817_v57 = vpop.f32.mrb[6].mxu1  ;;  %v858_v58 = vpop.f32.mrb[10].mxu0  ;;  %v3121_v43 = vld [vmem:[#allocation2 + $0x2a0] ss:$16 sps:$4 sm:$0xff]   ;;  %v3129_v44 = vld [vmem:[#allocation2 + $0x2c4] ss:$16 sps:$4 sm:$0xff]  }
 0x38f   :  { %vm862_vm7 = vcmp.gt.f32.partialorder %v814_v48, 0.0  ;;  %v867_v59 = vmul.f32 %v866_v46, %v814_v48  ;;  %vm864_vm8 = vcmp.gt.f32.partialorder %v855_v49, 0.0  ;;  %v869_v60 = vmul.f32 %v866_v46, %v855_v49  ;;  %v818_v61 = vpop.f32.mrb[7].mxu1  ;;  %v859_v62 = vpop.f32.mrb[11].mxu0  ;;  %v3127_v45 = vld [vmem:[#allocation2 + $0x2c0] ss:$16 sps:$4 sm:$0xff]  }
 0x390   :  { %vm863_vm9 = vcmp.gt.f32.partialorder %v816_v55, 0.0  ;;  %v868_v63 = vmul.f32 %v866_v46, %v816_v55  ;;  %vm865_vm10 = vcmp.gt.f32.partialorder %v857_v56, 0.0  ;;  %v870_v0 = vmul.f32 %v866_v46, %v857_v56  ;;  %v3135_v46 = vld [vmem:[#allocation2 + $0x2e4] ss:$16 sps:$4 sm:$0xff]   ;;  %v3133_v47 = vld [vmem:[#allocation2 + $0x2e0] ss:$16 sps:$4 sm:$0xff]  }
 0x391   :  { %v871_v2 = vsel %vm862_vm7, %v814_v48, %v867_v59  ;;  %v873_v3 = vsel %vm864_vm8, %v855_v49, %v869_v60  ;;  %v3141_v48 = vld [vmem:[#allocation2 + $0x304] ss:$16 sps:$4 sm:$0xff]   ;;  %v3139_v49 = vld [vmem:[#allocation2 + $0x300] ss:$16 sps:$4 sm:$0xff]  }
 0x392   :  { %v872_v4 = vsel %vm863_vm9, %v816_v55, %v868_v63  ;;  %v874_v5 = vsel %vm865_vm10, %v857_v56, %v870_v0  ;;  %v875_v9 = vpack.c.bf16 %v871_v2, %v871_v2  ;;  %v877_v10 = vpack.c.bf16 %v873_v3, %v873_v3  ;;  %v3147_v50 = vld [vmem:[#allocation2 + $0x324] ss:$16 sps:$4 sm:$0xff]   ;;  %v3145_v53 = vld [vmem:[#allocation2 + $0x320] ss:$16 sps:$4 sm:$0xff]  }
 0x393   :  { %v876_v6 = vpack.c.bf16 %v872_v4, %v872_v4  ;;  %v878_v7 = vpack.c.bf16 %v874_v5, %v874_v5  ;;  %v3153_v55 = vld [vmem:[#allocation2 + $0x344] ss:$16 sps:$4 sm:$0xff]   ;;  %v3151_v56 = vld [vmem:[#allocation2 + $0x340] ss:$16 sps:$4 sm:$0xff]  }
 0x394   :  { %v3159_v57 = vld [vmem:[#allocation2 + $0x364] ss:$16 sps:$4 sm:$0xff]   ;;  %v3157_v58 = vld [vmem:[#allocation2 + $0x360] ss:$16 sps:$4 sm:$0xff]  }
 0x395   :  { %1174 = vmatprep.mubr.bf16.mxu1 %v876_v6  ;;  %1214 = vmatprep.mubr.bf16.mxu0 %v878_v7  ;;  %v3165_v59 = vld [vmem:[#allocation2 + $0x384] ss:$16 sps:$4 sm:$0xff]   ;;  %v3163_v60 = vld [vmem:[#allocation2 + $0x380] ss:$16 sps:$4 sm:$0xff]  }
 0x396   :  { %1175 = vmatmul.mubr.bf16.vlgmr.msra.gmra.mrb[8].mxu1 %v875_v9  ;;  %1215 = vmatmul.mubr.bf16.vlgmr.msra.gmra.mrb[12].mxu0 %v877_v10  ;;  %v3171_v61 = vld [vmem:[#allocation2 + $0x3a4] ss:$16 sps:$4 sm:$0xff]   ;;  %v3169_v62 = vld [vmem:[#allocation2 + $0x3a0] ss:$16 sps:$4 sm:$0xff]  }
 0x397   :  { %2882 = vmatpush3.bf16.msra.mxu1 %v3065_v8  ;;  %2885 = vmatprep.mubr.msk.bf16.mxu1 %vm3266_vm1, %v3265_v1  ;;  %v2516_v2 = vld [vmem:[%s3775_s11] ss:$0 sm:$0xff] }
 0x398   :  { %2883 = vmatprep.subr.bf16.mxu1 %v3265_v1  ;;  %1880 = vmatpush1.bf16.msra.mxu0 %v3091_v28  ;;  %v3112_v28 = vld [vmem:[#allocation2 + $0x268] ss:$16 sps:$4 sm:$0xff]  }
 0x399   :  { %1881 = vmatprep.subr.bf16.mxu0 %v3099_v31  ;;  %v3126_v31 = vld [vmem:[#allocation2 + $0x2ac] ss:$16 sps:$4 sm:$0xff]  }
 0x39b   :  { %2884 = vmatpush3.bf16.msra.mxu1 %v3066_v11 }
 0x39c   :  { %1420 = vmatprep.subr.bf16.mxu1 %v3069_v12  ;;  %1882 = vmatpush1.bf16.msra.mxu0 %v3097_v32  ;;  %v3124_v32 = vld [vmem:[#allocation2 + $0x2a8] ss:$16 sps:$4 sm:$0xff]  }
 0x39d   :  { %1883 = vmatprep.subr.bf16.mxu0 %v3105_v33  ;;  %v3132_v33 = vld [vmem:[#allocation2 + $0x2cc] ss:$16 sps:$4 sm:$0xff]  }
 0x39e   :  { %2886 = vmatmul.mubr.msk.bf16.vlgmr.msra.gmra.mrb[12].mxu1 %vm164_vm3, %v1248_v15 }
 0x39f   :  { %1421 = vmatpush1.bf16.msra.mxu1 %v3067_v13  ;;  %1452 = vmatprep.mubr.bf16.mxu1 %v3268_v35  ;;  %v3076_v35 = vld [vmem:[%s3767_s3 + $0xb0] ss:$8 sps:$4 sm:$0xff]   ;;  %s2560_s3 = sld [smem:[#allocation5 + $0x81]]  ;;  %v2556_v13 = vld [vmem:[%s3772_s8 + $0x1] ss:$0 sm:$0xff] }
 0x3a0   :  { %1422 = vmatprep.subr.bf16.mxu1 %v3072_v14  ;;  %1884 = vmatpush1.bf16.msra.mxu0 %v3103_v34  ;;  %v3130_v34 = vld [vmem:[#allocation2 + $0x2c8] ss:$16 sps:$4 sm:$0xff]  }
 0x3a1   :  { %1885 = vmatprep.subr.bf16.mxu0 %v3111_v36  ;;  %v3138_v36 = vld [vmem:[#allocation2 + $0x2ec] ss:$16 sps:$4 sm:$0xff]  }
 0x3a3   :  { %1423 = vmatpush1.bf16.msra.mxu1 %v3070_v16 }
 0x3a4   :  { %1424 = vmatprep.subr.bf16.mxu1 %v3075_v17  ;;  %1886 = vmatpush1.bf16.msra.mxu0 %v3109_v37  ;;  %v3136_v37 = vld [vmem:[#allocation2 + $0x2e8] ss:$16 sps:$4 sm:$0xff]  }
 0x3a5   :  { %1887 = vmatprep.subr.bf16.mxu0 %v3117_v39  ;;  %v1306_v15 = vstv %s2560_s3  ;;  %v3144_v39 = vld [vmem:[#allocation2 + $0x30c] ss:$16 sps:$4 sm:$0xff]  }
 0x3a7   :  { %1425 = vmatpush1.bf16.msra.mxu1 %v3073_v18 }
 0x3a8   :  { %1426 = vmatprep.subr.bf16.mxu1 %v3078_v19  ;;  %1888 = vmatpush1.bf16.msra.mxu0 %v3115_v41  ;;  %v3142_v41 = vld [vmem:[#allocation2 + $0x308] ss:$16 sps:$4 sm:$0xff]  }
 0x3a9   :  { %1889 = vmatprep.subr.bf16.mxu0 %v3123_v42  ;;  %v3150_v42 = vld [vmem:[#allocation2 + $0x32c] ss:$16 sps:$4 sm:$0xff]  }
 0x3ab   :  { %1427 = vmatpush1.bf16.msra.mxu1 %v3076_v35 }
 0x3ac   :  { %1428 = vmatprep.subr.bf16.mxu1 %v3081_v20  ;;  %1890 = vmatpush1.bf16.msra.mxu0 %v3121_v43  ;;  %v3148_v43 = vld [vmem:[#allocation2 + $0x328] ss:$16 sps:$4 sm:$0xff]  }
 0x3ad   :  { %1891 = vmatprep.subr.bf16.mxu0 %v3129_v44  ;;  %v3156_v44 = vld [vmem:[#allocation2 + $0x34c] ss:$16 sps:$4 sm:$0xff]  }
 0x3af   :  { %1429 = vmatpush1.bf16.msra.mxu1 %v3079_v21  ;;  %v3094_v21 = vld [vmem:[#allocation2 + $0x208] ss:$16 sps:$4 sm:$0xff]  }
 0x3b0   :  { %1430 = vmatprep.subr.bf16.mxu1 %v3084_v22  ;;  %1892 = vmatpush1.bf16.msra.mxu0 %v3127_v45  ;;  %v3154_v45 = vld [vmem:[#allocation2 + $0x348] ss:$16 sps:$4 sm:$0xff]  }
 0x3b1   :  { %1893 = vmatprep.subr.bf16.mxu0 %v3135_v46  ;;  %v3162_v46 = vld [vmem:[#allocation2 + $0x36c] ss:$16 sps:$4 sm:$0xff]  }
 0x3b3   :  { %1431 = vmatpush1.bf16.msra.mxu1 %v3082_v23  ;;  %v3102_v23 = vld [vmem:[#allocation2 + $0x22c] ss:$16 sps:$4 sm:$0xff]  }
 0x3b4   :  { %1432 = vmatprep.subr.bf16.mxu1 %v3087_v24  ;;  %1894 = vmatpush1.bf16.msra.mxu0 %v3133_v47  ;;  %v3100_v24 = vld [vmem:[#allocation2 + $0x228] ss:$16 sps:$4 sm:$0xff]  }
 0x3b5   :  { %1895 = vmatprep.subr.bf16.mxu0 %v3141_v48  ;;  %v3160_v47 = vld [vmem:[#allocation2 + $0x368] ss:$16 sps:$4 sm:$0xff]   ;;  %v3168_v48 = vld [vmem:[#allocation2 + $0x38c] ss:$16 sps:$4 sm:$0xff]  }
 0x3b7   :  { %1433 = vmatpush1.bf16.msra.mxu1 %v3085_v25  ;;  %v3108_v25 = vld [vmem:[#allocation2 + $0x24c] ss:$16 sps:$4 sm:$0xff]  }
 0x3b8   :  { %1434 = vmatprep.subr.bf16.mxu1 %v3090_v26  ;;  %1896 = vmatpush1.bf16.msra.mxu0 %v3139_v49  ;;  %v3106_v26 = vld [vmem:[#allocation2 + $0x248] ss:$16 sps:$4 sm:$0xff]  }
 0x3b9   :  { %1897 = vmatprep.subr.bf16.mxu0 %v3147_v50  ;;  %v3166_v49 = vld [vmem:[#allocation2 + $0x388] ss:$16 sps:$4 sm:$0xff]   ;;  %v3174_v50 = vld [vmem:[#allocation2 + $0x3ac] ss:$16 sps:$4 sm:$0xff]  }
 0x3bb   :  { %1435 = vmatpush1.bf16.msra.mxu1 %v3088_v27  ;;  %v3114_v27 = vld [vmem:[#allocation2 + $0x26c] ss:$16 sps:$4 sm:$0xff]  }
 0x3bc   :  { %1920 = vmatprep.subr.bf16.mxu1 %v3096_v30  ;;  %1898 = vmatpush1.bf16.msra.mxu0 %v3145_v53  ;;  %v3118_v30 = vld [vmem:[#allocation2 + $0x288] ss:$16 sps:$4 sm:$0xff]  }
 0x3bd   :  { %1899 = vmatprep.subr.bf16.mxu0 %v3153_v55  ;;  %v3172_v53 = vld [vmem:[#allocation2 + $0x3a8] ss:$16 sps:$4 sm:$0xff]   ;;  %v3177_v55 = vld [vmem:[#allocation2 + $0x3c4] ss:$16 sps:$4 sm:$0xff]  }
 0x3c0   :  { %1900 = vmatpush1.bf16.msra.mxu0 %v3151_v56  ;;  %v3180_v56 = vld [vmem:[#allocation2 + $0x3cc] ss:$16 sps:$4 sm:$0xff]  }
 0x3c1   :  { %1901 = vmatprep.subr.bf16.mxu0 %v3159_v57  ;;  %v3175_v57 = vld [vmem:[#allocation2 + $0x3c0] ss:$16 sps:$4 sm:$0xff]  }
 0x3c4   :  { %1902 = vmatpush1.bf16.msra.mxu0 %v3157_v58  ;;  %v3178_v58 = vld [vmem:[#allocation2 + $0x3c8] ss:$16 sps:$4 sm:$0xff]  }
 0x3c5   :  { %1903 = vmatprep.subr.bf16.mxu0 %v3165_v59  ;;  %v3183_v59 = vld [vmem:[#allocation2 + $0x3e4] ss:$16 sps:$4 sm:$0xff]  }
 0x3c8   :  { %1904 = vmatpush1.bf16.msra.mxu0 %v3163_v60  ;;  %v3186_v60 = vld [vmem:[#allocation2 + $0x3ec] ss:$16 sps:$4 sm:$0xff]  }
 0x3c9   :  { %1905 = vmatprep.subr.bf16.mxu0 %v3171_v61  ;;  %v3181_v61 = vld [vmem:[#allocation2 + $0x3e0] ss:$16 sps:$4 sm:$0xff]  }
 0x3cc   :  { %1906 = vmatpush1.bf16.msra.mxu0 %v3169_v62  ;;  %v3184_v62 = vld [vmem:[#allocation2 + $0x3e8] ss:$16 sps:$4 sm:$0xff]  }
 0x3cd   :  { %1907 = vmatprep.subr.bf16.mxu0 %v3177_v55 }
 0x3d0   :  { %1908 = vmatpush1.bf16.msra.mxu0 %v3175_v57 }
 0x3d1   :  { %1909 = vmatprep.subr.bf16.mxu0 %v3183_v59 }
 0x3d4   :  { %1910 = vmatpush1.bf16.msra.mxu0 %v3181_v61 }
 0x469   :  { %v2787_v63 = vpop.f32.mrb[8].mxu1  ;;  %v2809_v0 = vpop.f32.mrb[12].mxu0 }
 0x46a   :  { %v2788_v3 = vpop.f32.mrb[9].mxu1  ;;  %v2810_v4 = vpop.f32.mrb[13].mxu0 }
 0x46b   :  { %v2789_v5 = vadd.f32 %v2788_v3, %v2787_v63  ;;  %v2811_v6 = vadd.f32 %v2810_v4, %v2809_v0  ;;  %v2790_v7 = vpop.f32.mrb[10].mxu1  ;;  %v2812_v8 = vpop.f32.mrb[14].mxu0  ;;  %v3187_v63 = vld [vmem:[%s3769_s5 + $0x140] sm:$0xff]  }
 0x46c   :  { %v2791_v9 = vpop.f32.mrb[11].mxu1  ;;  %v2813_v10 = vpop.f32.mrb[15].mxu0  ;;  %v3188_v0 = vld [vmem:[%s3769_s5 + $0x1c0] sm:$0xff]   ;;  %2818 = vmatprep.subr.bf16.mxu0 %v3187_v63 }
 0x46d   :  { %v1177_v11 = vadd.f32 %v2789_v5, %v2516_v2  ;;  %v2577_v2 = vld [vmem:[%s3773_s9 + $0x2] sm:$0x3] }
 0x46e   :  { %v1333_v3 = vrot.slane %v2577_v2, %v3444_v52  ;;  %v1337_v4 = vrot.slane %v2577_v2, %v3450_v54 }
 0x46f   :  { %v3618_v12 = vadd.f32 %v2811_v6, %v1177_v11  ;;  %v1464_v6 = vstv %s2594_s24  ;;  %s2549_s24 = sld [smem:[#allocation5 + $0x4]] }
 0x471   :  { %v1298_v14 = vpop.f32.mrb[12].mxu1  ;;  %vm1223_vm4 = vcmp.gt.f32.partialorder %v3618_v12, 0.0 }
 0x472   :  { %v1299_v16 = vadd.f32 %v2556_v13, %v1298_v14  ;;  %v2887_v17 = vpop.f32.mrb[13].mxu1 }
 0x473   :  { %v1301_v18 = vpop.f32.mrb[14].mxu1 }
 0x474   :  { %vm1305_vm11 = vcmp.gt.f32.partialorder %v1299_v16, 0.0  ;;  %v1307_v19 = vmul.f32 %v1306_v15, %v1299_v16  ;;  %v2888_v35 = vpop.f32.mrb[15].mxu1  ;;  %v3189_v18 = vld [vmem:[%s3769_s5 + $0x100] sm:$0xff]  }
 0x476   :  { %v1308_v20 = vsel %vm1305_vm11, %v1299_v16, %v1307_v19  ;;  %v3190_v19 = vld [vmem:[%s3769_s5 + $0x180] sm:$0xff]  }
 0x477   :  { %v1309_v22 = vpack.c.bf16 %v1308_v20, %v1308_v20  ;;  %v3191_v20 = vld [vmem:[%s3769_s5 + $0x148] sm:$0xff]  }
 0x479   :  { %1453 = vmatmul.mubr.bf16.vlgmr.msra.gmra.mrb[16].mxu1 %v1309_v22  ;;  %v3193_v22 = vld [vmem:[%s3769_s5 + $0x108] sm:$0xff]  }
 0x47a   :  { %1921 = vmatpush1.bf16.msra.mxu1 %v3094_v21  ;;  %v3192_v21 = vld [vmem:[%s3769_s5 + $0x1c8] sm:$0xff]  }
 0x47b   :  { %1922 = vmatprep.subr.bf16.mxu1 %v3102_v23  ;;  %v3194_v23 = vld [vmem:[%s3769_s5 + $0x188] sm:$0xff]  }
 0x47e   :  { %1923 = vmatpush1.bf16.msra.mxu1 %v3100_v24  ;;  %v3195_v24 = vld [vmem:[%s3769_s5 + $0x150] sm:$0xff]  }
 0x47f   :  { %1924 = vmatprep.subr.bf16.mxu1 %v3108_v25  ;;  %v3196_v25 = vld [vmem:[%s3769_s5 + $0x1d0] sm:$0xff]  }
 0x482   :  { %1925 = vmatpush1.bf16.msra.mxu1 %v3106_v26  ;;  %v3197_v26 = vld [vmem:[%s3769_s5 + $0x110] sm:$0xff]  }
 0x483   :  { %1926 = vmatprep.subr.bf16.mxu1 %v3114_v27  ;;  %v3198_v27 = vld [vmem:[%s3769_s5 + $0x190] sm:$0xff]  }
 0x486   :  { %1927 = vmatpush1.bf16.msra.mxu1 %v3112_v28  ;;  %v3199_v28 = vld [vmem:[%s3769_s5 + $0x158] sm:$0xff]  }
 0x487   :  { %1928 = vmatprep.subr.bf16.mxu1 %v3120_v29  ;;  %v3200_v29 = vld [vmem:[%s3769_s5 + $0x1d8] sm:$0xff]  }
 0x48a   :  { %1929 = vmatpush1.bf16.msra.mxu1 %v3118_v30  ;;  %v3201_v30 = vld [vmem:[%s3769_s5 + $0x118] sm:$0xff]  }
 0x48b   :  { %1930 = vmatprep.subr.bf16.mxu1 %v3126_v31  ;;  %v3202_v31 = vld [vmem:[%s3769_s5 + $0x198] sm:$0xff]  }
 0x48e   :  { %1931 = vmatpush1.bf16.msra.mxu1 %v3124_v32  ;;  %v3203_v32 = vld [vmem:[%s3769_s5 + $0x160] sm:$0xff]  }
 0x48f   :  { %1932 = vmatprep.subr.bf16.mxu1 %v3132_v33  ;;  %v3204_v33 = vld [vmem:[%s3769_s5 + $0x1e0] sm:$0xff]  }
 0x492   :  { %1933 = vmatpush1.bf16.msra.mxu1 %v3130_v34  ;;  %v3205_v34 = vld [vmem:[%s3769_s5 + $0x120] sm:$0xff]  }
 0x493   :  { %1934 = vmatprep.subr.bf16.mxu1 %v3138_v36  ;;  %v3206_v36 = vld [vmem:[%s3769_s5 + $0x1a0] sm:$0xff]  }
 0x496   :  { %1935 = vmatpush1.bf16.msra.mxu1 %v3136_v37  ;;  %v3207_v37 = vld [vmem:[%s3769_s5 + $0x168] sm:$0xff]  }
 0x497   :  { %1936 = vmatprep.subr.bf16.mxu1 %v3144_v39  ;;  %v3208_v39 = vld [vmem:[%s3769_s5 + $0x1e8] sm:$0xff]  }
 0x49a   :  { %1937 = vmatpush1.bf16.msra.mxu1 %v3142_v41  ;;  %v3209_v41 = vld [vmem:[%s3769_s5 + $0x128] sm:$0xff]  }
 0x49b   :  { %1938 = vmatprep.subr.bf16.mxu1 %v3150_v42  ;;  %v3210_v42 = vld [vmem:[%s3769_s5 + $0x1a8] sm:$0xff]  }
 0x49e   :  { %1939 = vmatpush1.bf16.msra.mxu1 %v3148_v43  ;;  %v3211_v43 = vld [vmem:[%s3769_s5 + $0x170] sm:$0xff]  }
 0x49f   :  { %1940 = vmatprep.subr.bf16.mxu1 %v3156_v44  ;;  %v3212_v44 = vld [vmem:[%s3769_s5 + $0x1f0] sm:$0xff]  }
 0x4a2   :  { %1941 = vmatpush1.bf16.msra.mxu1 %v3154_v45  ;;  %v3213_v45 = vld [vmem:[%s3769_s5 + $0x130] sm:$0xff]  }
 0x4a3   :  { %1942 = vmatprep.subr.bf16.mxu1 %v3162_v46  ;;  %v3214_v46 = vld [vmem:[%s3769_s5 + $0x1b0] sm:$0xff]  }
 0x4a6   :  { %1943 = vmatpush1.bf16.msra.mxu1 %v3160_v47  ;;  %v3215_v47 = vld [vmem:[%s3769_s5 + $0x178] sm:$0xff]  }
 0x4a7   :  { %1944 = vmatprep.subr.bf16.mxu1 %v3168_v48  ;;  %v3216_v48 = vld [vmem:[%s3769_s5 + $0x1f8] sm:$0xff]  }
 0x4aa   :  { %1945 = vmatpush1.bf16.msra.mxu1 %v3166_v49  ;;  %v3217_v49 = vld [vmem:[%s3769_s5 + $0x138] sm:$0xff]  }
 0x4ab   :  { %1946 = vmatprep.subr.bf16.mxu1 %v3174_v50  ;;  %v3218_v50 = vld [vmem:[%s3769_s5 + $0x1b8] sm:$0xff]  }
 0x4ae   :  { %1947 = vmatpush1.bf16.msra.mxu1 %v3172_v53  ;;  %v2595_v53 = vld [vmem:[%s3774_s10 + $0x4] sm:$0xf] }
 0x4af   :  { %1948 = vmatprep.subr.bf16.mxu1 %v3180_v56  ;;  %v1542_v55 = vrot.slane %v2595_v53, %v3444_v52  ;;  %v1550_v56 = vrot.slane %v2595_v53, %v449_v38  ;;  %v1546_v57 = vrot.slane %v2595_v53, %v3450_v54 }
 0x4b2   :  { %1949 = vmatpush1.bf16.msra.mxu1 %v3178_v58  ;;  %v1554_v58 = vrot.slane %v2595_v53, %v453_v40 }
 0x4b3   :  { %1950 = vmatprep.subr.bf16.mxu1 %v3186_v60  ;;  %v1966_v60 = vstv %s2660_s30 }
 0x4b6   :  { %1951 = vmatpush1.bf16.msra.mxu1 %v3184_v62 }
 0x4b7   :  { %2840 = vmatprep.subr.bf16.mxu1 %v3188_v0 }
 0x54c   :  { %v1454_v5 = vpop.f32.mrb[16].mxu1 }
 0x54d   :  { %v1455_v7 = vadd.f32 %v1454_v5, %v1333_v3  ;;  %v1456_v8 = vpop.f32.mrb[17].mxu1 }
 0x54e   :  { %v1457_v9 = vadd.f32 %v1456_v8, %v1337_v4  ;;  %v1458_v10 = vpop.f32.mrb[18].mxu1 }
 0x54f   :  { %vm1462_vm12 = vcmp.gt.f32.partialorder %v1455_v7, 0.0  ;;  %v1465_v11 = vmul.f32 %v1464_v6, %v1455_v7  ;;  %v1459_v13 = vpop.f32.mrb[19].mxu1 }
 0x550   :  { %vm1463_vm13 = vcmp.gt.f32.partialorder %v1457_v9, 0.0  ;;  %v1466_v14 = vmul.f32 %v1464_v6, %v1457_v9 }
 0x551   :  { %v1467_v15 = vsel %vm1462_vm12, %v1455_v7, %v1465_v11 }
 0x552   :  { %v1468_v16 = vsel %vm1463_vm13, %v1457_v9, %v1466_v14  ;;  %v1469_v35 = vpack.c.bf16 %v1467_v15, %v1467_v15 }
 0x553   :  { %v1470_v17 = vpack.c.bf16 %v1468_v16, %v1468_v16 }
 0x555   :  { %1911 = vmatprep.mubr.bf16.mxu0 %v1470_v17  ;;  %1952 = vmatprep.mubr.bf16.mxu1 %v1470_v17  ;;  %v3219_v17 = vld [vmem:[%s3770_s6] sm:$0xff]  }
 0x556   :  { %1912 = vmatmul.mubr.bf16.vlgmr.msra.gmra.mrb[16].mxu0 %v1469_v35  ;;  %1953 = vmatmul.mubr.bf16.vlgmr.msra.gmra.mrb[20].mxu1 %v1469_v35  ;;  %v3222_v35 = vld [vmem:[%s3770_s6 + $0x18] sm:$0xff]  }
 0x557   :  { %2819 = vmatpush3.bf16.msra.mxu0 %v3189_v18  ;;  %2841 = vmatpush3.bf16.msra.mxu1 %v3190_v19  ;;  %v3220_v18 = vld [vmem:[%s3770_s6 + $0x8] sm:$0xff]   ;;  %v3221_v19 = vld [vmem:[%s3770_s6 + $0x10] sm:$0xff]   ;;  %s3269_s6 = smov 32  }
 0x558   :  { %2820 = vmatprep.subr.bf16.mxu0 %v3191_v20  ;;  %2842 = vmatprep.subr.bf16.mxu1 %v3192_v21 }
 0x55b   :  { %2821 = vmatpush3.bf16.msra.mxu0 %v3193_v22  ;;  %2843 = vmatpush3.bf16.msra.mxu1 %v3194_v23  ;;  %v2726_v22 = vld [vmem:[%s3775_s11 + $0x1] ss:$0 sm:$0xff] }
 0x55c   :  { %2822 = vmatprep.subr.bf16.mxu0 %v3195_v24  ;;  %2844 = vmatprep.subr.bf16.mxu1 %v3196_v25 }
 0x55f   :  { %2823 = vmatpush3.bf16.msra.mxu0 %v3197_v26  ;;  %2845 = vmatpush3.bf16.msra.mxu1 %v3198_v27 }
 0x560   :  { %2824 = vmatprep.subr.bf16.mxu0 %v3199_v28  ;;  %2846 = vmatprep.subr.bf16.mxu1 %v3200_v29 }
 0x563   :  { %2825 = vmatpush3.bf16.msra.mxu0 %v3201_v30  ;;  %2847 = vmatpush3.bf16.msra.mxu1 %v3202_v31 }
 0x564   :  { %2826 = vmatprep.subr.bf16.mxu0 %v3203_v32  ;;  %2848 = vmatprep.subr.bf16.mxu1 %v3204_v33  ;;  %v2326_v32 = vstv %s2759_s21 }
 0x567   :  { %2827 = vmatpush3.bf16.msra.mxu0 %v3205_v34  ;;  %2849 = vmatpush3.bf16.msra.mxu1 %v3206_v36 }
 0x568   :  { %2828 = vmatprep.subr.bf16.mxu0 %v3207_v37  ;;  %2850 = vmatprep.subr.bf16.mxu1 %v3208_v39  ;;  %v1224_v37 = vstv %s2549_s24 }
 0x569   :  { %v1225_v39 = vmul.f32 %v1224_v37, %v3618_v12 }
 0x56b   :  { %2829 = vmatpush3.bf16.msra.mxu0 %v3209_v41  ;;  %2851 = vmatpush3.bf16.msra.mxu1 %v3210_v42  ;;  %v1226_v41 = vsel %vm1223_vm4, %v3618_v12, %v1225_v39 }
 0x56c   :  { %2830 = vmatprep.subr.bf16.mxu0 %v3211_v43  ;;  %2852 = vmatprep.subr.bf16.mxu1 %v3212_v44  ;;  %v1227_v42 = vpack.c.bf16 %v1226_v41, %v1226_v41 }
 0x56f   :  { %2831 = vmatpush3.bf16.msra.mxu0 %v3213_v45  ;;  %2853 = vmatpush3.bf16.msra.mxu1 %v3214_v46  ;;  %v2760_v45 = vld [vmem:[%s3776_s12] ss:$0 sm:$0xff] }
 0x570   :  { %2832 = vmatprep.subr.bf16.mxu0 %v3215_v47  ;;  %2854 = vmatprep.subr.bf16.mxu1 %v3216_v48 }
 0x573   :  { %2833 = vmatpush3.bf16.msra.mxu0 %v3217_v49  ;;  %2855 = vmatpush3.bf16.msra.mxu1 %v3218_v50 }
 0x574   :  { %2889 = vmatprep.subr.bf16.mxu0 %v3265_v1 }
 0x629   :  { %v1913_v59 = vpop.f32.mrb[16].mxu0  ;;  %v1954_v61 = vpop.f32.mrb[20].mxu1 }
 0x62a   :  { %v1914_v62 = vadd.f32 %v1913_v59, %v1542_v55  ;;  %v1955_v63 = vadd.f32 %v1954_v61, %v1550_v56  ;;  %v1915_v0 = vpop.f32.mrb[17].mxu0  ;;  %v1956_v2 = vpop.f32.mrb[21].mxu1 }
 0x62b   :  { %v1916_v3 = vadd.f32 %v1915_v0, %v1546_v57  ;;  %v1957_v4 = vadd.f32 %v1956_v2, %v1554_v58  ;;  %v1917_v5 = vpop.f32.mrb[18].mxu0  ;;  %v1958_v6 = vpop.f32.mrb[22].mxu1 }
 0x62c   :  { %vm1962_vm14 = vcmp.gt.f32.partialorder %v1914_v62, 0.0  ;;  %v1967_v52 = vmul.f32 %v1966_v60, %v1914_v62  ;;  %vm1964_vm15 = vcmp.gt.f32.partialorder %v1955_v63, 0.0  ;;  %v1969_v38 = vmul.f32 %v1966_v60, %v1955_v63  ;;  %v1918_v7 = vpop.f32.mrb[19].mxu0  ;;  %v1959_v54 = vpop.f32.mrb[23].mxu1 }
 0x62d   :  { %vm1963_vm0 = vcmp.gt.f32.partialorder %v1916_v3, 0.0  ;;  %v1968_v51 = vmul.f32 %v1966_v60, %v1916_v3  ;;  %vm1965_vm2 = vcmp.gt.f32.partialorder %v1957_v4, 0.0  ;;  %v1970_v40 = vmul.f32 %v1966_v60, %v1957_v4 }
 0x62e   :  { %v1971_v8 = vsel %vm1962_vm14, %v1914_v62, %v1967_v52  ;;  %v1973_v9 = vsel %vm1964_vm15, %v1955_v63, %v1969_v38 }
 0x62f   :  { %v1972_v10 = vsel %vm1963_vm0, %v1916_v3, %v1968_v51  ;;  %v1974_v11 = vsel %vm1965_vm2, %v1957_v4, %v1970_v40  ;;  %v1975_v15 = vpack.c.bf16 %v1971_v8, %v1971_v8  ;;  %v1977_v16 = vpack.c.bf16 %v1973_v9, %v1973_v9 }
 0x630   :  { %v1976_v13 = vpack.c.bf16 %v1972_v10, %v1972_v10  ;;  %v1978_v14 = vpack.c.bf16 %v1974_v11, %v1974_v11 }
 0x632   :  { %2276 = vmatprep.mubr.bf16.mxu0 %v1976_v13  ;;  %2316 = vmatprep.mubr.bf16.mxu1 %v1978_v14 }
 0x633   :  { %2277 = vmatmul.mubr.bf16.vlgmr.msra.gmra.mrb[20].mxu0 %v1975_v15  ;;  %2317 = vmatmul.mubr.bf16.vlgmr.msra.gmra.mrb[24].mxu1 %v1977_v16 }
 0x634   :  { %2897 = vmatprep.mubr.msk.bf16.mxu0 %vm3266_vm1, %v3265_v1  ;;  %2890 = vmatpush3.bf16.msra.mxu0 %v3219_v17 }
 0x635   :  { %2891 = vmatprep.subr.bf16.mxu0 %v3265_v1 }
 0x638   :  { %2892 = vmatpush3.bf16.msra.mxu0 %v3220_v18 }
 0x639   :  { %2893 = vmatprep.subr.bf16.mxu0 %v3265_v1 }
 0x63c   :  { %2894 = vmatpush3.bf16.msra.mxu0 %v3221_v19 }
 0x63d   :  { %2895 = vmatprep.subr.bf16.mxu0 %v3265_v1 }
 0x640   :  { %2896 = vmatpush3.bf16.msra.mxu0 %v3222_v35 }
 0x706   :  { %v2834_v20 = vpop.f32.mrb[20].mxu0  ;;  %v2856_v21 = vpop.f32.mrb[24].mxu1 }
 0x707   :  { %v2835_v23 = vpop.f32.mrb[21].mxu0  ;;  %v2857_v24 = vpop.f32.mrb[25].mxu1 }
 0x708   :  { %v2836_v25 = vadd.f32 %v2835_v23, %v2834_v20  ;;  %v2858_v26 = vadd.f32 %v2857_v24, %v2856_v21  ;;  %v2837_v27 = vpop.f32.mrb[22].mxu0  ;;  %v2859_v28 = vpop.f32.mrb[26].mxu1 }
 0x709   :  { %v2838_v29 = vpop.f32.mrb[23].mxu0  ;;  %v2860_v30 = vpop.f32.mrb[27].mxu1 }
 0x70a   :  { %v2279_v31 = vadd.f32 %v2836_v25, %v2726_v22 }
 0x70c   :  { %v2319_v33 = vadd.f32 %v2858_v26, %v2279_v31 }
 0x70e   :  { %v2327_v1 = vmul.f32 %v2326_v32, %v2319_v33  ;;  %vm2325_vm1 = vcmp.gt.f32.partialorder %v2319_v33, 0.0 }
 0x710   :  { %v2328_v34 = vsel %vm2325_vm1, %v2319_v33, %v2327_v1 }
 0x711   :  { %v2329_v36 = vpack.c.bf16 %v2328_v34, %v2328_v34 }
 0x713   :  { %2331 = vrot.lane.b32.xlu0 %v2329_v36, %s3269_s6 }
 0x785   :  { %v2332_v43 = vpop.permute.xlu0 %2331 }
 0x786   :  { %v2335_v44 = vsel %vm164_vm3, %v1227_v42, %v2332_v43 }
 0x787   :  { %2898 = vmatmul.mubr.msk.bf16.vlgmr.msra.gmra.mrb[24].mxu0 %vm2375_vm5, %v2335_v44 }
 0x85a   :  { %v2412_v46 = vpop.f32.mrb[24].mxu0 }
 0x85b   :  { %v2413_v47 = vadd.f32 %v2760_v45, %v2412_v46  ;;  %v2899_v48 = vpop.f32.mrb[25].mxu0 }
 0x85c   :  { %v2415_v49 = vpop.f32.mrb[26].mxu0 }
 0x85d   :  { %2419 = vst.msk [vmem:[%s3778_s14] sm:$0xff] %vm2418_vm6, %v2413_v47  ;;  %v2900_v12 = vpop.f32.mrb[27].mxu0 }
 0x85e   :  { %2424 = vsyncpa [#allocation3], 1 }
 0x85f   :  { %2425 = vsyncpa [#allocation4], 1 }

</bundles_post_ra>
